<compile_context>
chip_gen: v5e
topology: v5e:2x2
jax: 0.10.0
libtpu: 0.0.40
codegen_flags: <defaults>
</compile_context>

<pallas_src>
import numpy as np
import jax
import jax.numpy as jnp
from jax.experimental import pallas as pl
from jax.experimental.pallas import tpu as pltpu


def _round_up(x: int, m: int) -> int:
    return ((x + m - 1) // m) * m


# ----------------------------- Pallas kernel -----------------------------

def _make_fused_kernel(slot_off, slot_pad, n_hidden):
    """Fused decoder kernel.

    Ref order: z, (W_0, b_0), ..., (W_{n_hidden-1}, b_{n_hidden-1}),
               W_rec(bf16), b_rec, out, concat_scratch.
    Concat buffer layout is newest-first: block j occupies columns
    [slot_off[j], slot_off[j] + slot_pad[j]), matching torch.cat((z, out), 1).
    """

    def kernel(*refs):
        z_ref = refs[0]
        hid_refs = refs[1:1 + 2 * n_hidden]
        wf_ref = refs[1 + 2 * n_hidden]
        bf_ref = refs[2 + 2 * n_hidden]
        o_ref = refs[3 + 2 * n_hidden]
        buf_ref = refs[4 + 2 * n_hidden]

        # Build the concatenated-activation buffer once per (batch-tile,
        # gene-outer) pair; it stays resident in VMEM across the inner gene
        # axis.  Invariant: the inner gene axis must remain the LAST grid axis
        # and be marked "arbitrary".  The outer gene axis may be core-split
        # ("parallel") because each core rebuilds its own buffer copy here.
        @pl.when(pl.program_id(2) == 0)
        def _():
            # Latent / root block occupies the oldest (last) slot.
            buf_ref[:, slot_off[0]:slot_off[0] + slot_pad[0]] = z_ref[...]
            for i in range(n_hidden):
                w_ref = hid_refs[2 * i]
                b_ref = hid_refs[2 * i + 1]
                # Input = newest-first suffix of the concat buffer.
                x = buf_ref[:, slot_off[i]:]
                zi = jnp.dot(x, w_ref[...],
                             preferred_element_type=jnp.float32,
                             precision=jax.lax.Precision.HIGHEST)
                zi = zi + b_ref[...]
                o_off = slot_off[i + 1]
                buf_ref[:, o_off:o_off + slot_pad[i + 1]] = zi

        # Final reconstruction layer (no rec_activation), tiled over genes.
        # bf16 inputs, f32 accumulation: native MXU rate + half the W_rec
        # HBM stream.
        acc = jnp.dot(buf_ref[...].astype(jnp.bfloat16), wf_ref[...],
                      preferred_element_type=jnp.float32)
        o_ref[...] = (acc + bf_ref[...]).astype(o_ref.dtype)

    return kernel


def _pad_weight(w, in_dims, in_pads, out_pad):
    """Insert zero rows so each input block starts at its 128-padded offset,
    and zero-pad output columns. w: (sum(in_dims), outs) -> (sum(in_pads), out_pad)."""
    outs = int(w.shape[1])
    parts = []
    r = 0
    for d_k, p_k in zip(in_dims, in_pads):
        blk = w[r:r + d_k]
        if p_k > d_k:
            blk = jnp.pad(blk, ((0, p_k - d_k), (0, 0)))
        parts.append(blk)
        r += d_k
    wp = parts[0] if len(parts) == 1 else jnp.concatenate(parts, axis=0)
    if out_pad > outs:
        wp = jnp.pad(wp, ((0, 0), (0, out_pad - outs)))
    return wp


# ------------------------------- forward ---------------------------------

def onto_decoder_forward(z, params, single_buffer_consts=True):
    """OntoDecoder.forward (root_layer_latent=True, cat_dim=0) as one fused kernel.

    z: (batch, latent_dim) f32; params: list of (W (ins, outs), b (1, outs)).
    """
    B, d0 = z.shape
    hidden = params[:-1]
    wf, bf = params[-1]
    n_hidden = len(hidden)

    # Per-block widths z0 .. z_{L-1} and their 128-lane padded slot widths.
    d = [int(d0)] + [int(w.shape[1]) for (w, _) in hidden]
    L = len(d)
    p = [_round_up(di, 128) for di in d]
    K_pad = sum(p)
    # Newest-first layout: block j starts after all newer blocks.
    slot_off = [sum(p[j + 1:]) for j in range(L)]

    n_out = int(wf.shape[1])
    N_pad = _round_up(n_out, 128)

    # Hidden W/b resident VMEM (conservatively counted double-buffered).
    hid_bytes = sum(2 * (sum(p[:i + 1]) * p[i + 1] * 4 + p[i + 1] * 4)
                    for i in range(n_hidden))

    def vmem_usage(tm, tn):
        return (tm * K_pad * 4                       # resident concat scratch (f32)
                + 2 * tm * p[0] * 4                  # z tile (double-buffered)
                + hid_bytes                          # hidden W/b
                + 2 * (K_pad * tn * 2 + tn * 4)      # bf16 W_rec panel + b_rec (x2)
                + 2 * tm * tn * 4)                   # output tile (x2)

    # Conservative working budget that also fits v7x's 64 MiB physical VMEM.
    BUDGET = 48 * 1024 * 1024

    # Gene tile: prefer wide, lane-dense tiles (great on v6e/v5e with 128 MiB
    # VMEM) but only if they fit the conservative budget.
    tm_est = max(8, min(512, _round_up(B, 8)))
    tn = 128
    for cand in (512, 256):
        if N_pad % cand == 0 and vmem_usage(tm_est, cand) <= BUDGET:
            tn = cand
            break

    # Batch tile: one tile for small/moderate B (W_rec streams from HBM exactly
    # once); up to 512 rows for large B to minimize W_rec re-streaming.
    if B <= 512:
        tm = max(8, _round_up(B, 8))
        B_pad = tm
    else:
        tm = 512
        while tm > 64 and vmem_usage(tm, tn) > BUDGET:
            tm //= 2
        B_pad = _round_up(B, tm)

    vmem_limit = int(min(max(vmem_usage(tm, tn) * 5 // 4 + (2 << 20), 32 << 20),
                         64 << 20))

    # Split the gene axis into (outer "parallel", inner "arbitrary") so the
    # second TensorCore on v7x gets work even with a single batch tile.
    n_gene_tiles = N_pad // tn
    split_genes = (B_pad // tm == 1) and (n_gene_tiles >= 2) and (n_gene_tiles % 2 == 0)
    GO = 2 if split_genes else 1
    GI = n_gene_tiles // GO

    def _const_spec(shape):
        # Grid-invariant operand: request single-buffering (its block index
        # never changes, so double-buffering only wastes VMEM).
        if single_buffer_consts:
            try:
                return pl.BlockSpec(shape, lambda m, go, gi: (0, 0),
                                    pipeline_mode=pl.Buffered(1))
            except Exception:
                pass
        return pl.BlockSpec(shape, lambda m, go, gi: (0, 0))

    # ---- pad operands into the aligned layout (zero rows/cols are exact) ----
    z_pad = jnp.pad(z.astype(jnp.float32), ((0, B_pad - B), (0, p[0] - d[0])))
    operands = [z_pad]
    in_specs = [pl.BlockSpec((tm, p[0]), lambda m, go, gi: (m, 0))]
    for i, (w, b) in enumerate(hidden):
        in_dims = list(reversed(d[: i + 1]))   # newest-first row blocks
        in_pads = list(reversed(p[: i + 1]))
        wp = _pad_weight(w.astype(jnp.float32), in_dims, in_pads, p[i + 1])
        bp = jnp.pad(b.astype(jnp.float32), ((0, 0), (0, p[i + 1] - d[i + 1])))
        operands += [wp, bp]
        in_specs += [_const_spec((sum(in_pads), p[i + 1])),
                     _const_spec((1, p[i + 1]))]

    wf_pad = _pad_weight(wf.astype(jnp.float32),
                         list(reversed(d)), list(reversed(p)), N_pad)
    wf_pad = wf_pad.astype(jnp.bfloat16)       # halve the dominant HBM stream
    bf_pad = jnp.pad(bf.astype(jnp.float32), ((0, 0), (0, N_pad - n_out)))
    operands += [wf_pad, bf_pad]
    in_specs += [pl.BlockSpec((K_pad, tn), lambda m, go, gi: (0, go * GI + gi)),
                 pl.BlockSpec((1, tn), lambda m, go, gi: (0, go * GI + gi))]

    # Advisory cost estimate for XLA's scheduler.
    n_batch_tiles = B_pad // tm
    flops = (2 * B_pad * K_pad * N_pad
             + n_batch_tiles * GO * sum(2 * tm * sum(p[:i + 1]) * p[i + 1]
                                        for i in range(n_hidden)))
    bytes_accessed = (n_batch_tiles * K_pad * N_pad * 2     # bf16 W_rec stream
                      + B_pad * p[0] * 4                    # z
                      + B_pad * N_pad * 4                   # output
                      + hid_bytes // 2 + N_pad * 4)         # hidden W/b + b_rec
    cost = pl.CostEstimate(flops=int(flops), transcendentals=0,
                           bytes_accessed=int(bytes_accessed))

    out_pad = pl.pallas_call(
        _make_fused_kernel(tuple(slot_off), tuple(p), n_hidden),
        out_shape=jax.ShapeDtypeStruct((B_pad, N_pad), jnp.float32),
        grid=(B_pad // tm, GO, GI),
        in_specs=in_specs,
        out_specs=pl.BlockSpec((tm, tn), lambda m, go, gi: (m, go * GI + gi)),
        scratch_shapes=[pltpu.VMEM((tm, K_pad), jnp.float32)],
        compiler_params=pltpu.CompilerParams(
            dimension_semantics=("parallel", "parallel", "arbitrary"),
            vmem_limit_bytes=vmem_limit),
        cost_estimate=cost,
    )(*operands)
    return out_pad[:B, :n_out]


def onto_decoder_forward_ref(z, params):
    """Plain-JAX reference for validation (same math, default precision)."""
    out = z
    for (w, b) in params[:-1]:
        zi = jnp.dot(out, w) + b
        out = jnp.concatenate([zi, out], axis=1)   # torch.cat((z, out), dim=1)
    w, b = params[-1]
    return jnp.dot(out, w) + b


# --------------------------- parameter building ---------------------------

def build_onto_decoder_params(key, in_features, orig_layer_dims, neuronnum):
    """Deterministic synthetic parameters mirroring OntoDecoder.__init__.

    Returns list of (W, b) with W of shape (ins, outs) (already transposed),
    masked and clamped to be non-negative (pos_weights=True).
    """
    orig = np.asarray(orig_layer_dims, dtype=np.int64)
    scaled = np.hstack([orig[:-1] * neuronnum, orig[-1]])
    L = len(scaled) - 1  # number of decoder blocks (incl. reconstruction layer)

    layer_shapes = [(int(np.sum(scaled[: i + 1])), int(scaled[i + 1]))
                    for i in range(L)]

    params = []
    keys = jax.random.split(key, 3 * L)
    for i in range(L):
        if i < L - 1:
            outs = int(scaled[i + 1])
            ins = int(np.sum(scaled[: i + 1]))
            m = (jax.random.bernoulli(
                keys[3 * i], p=0.6,
                shape=(int(orig[i + 1]), int(np.sum(orig[: i + 1])))
            )).astype(jnp.float32)
            mask = jnp.repeat(jnp.repeat(m, neuronnum, axis=0), neuronnum, axis=1)
        else:
            outs = int(in_features)
            ins = layer_shapes[-1][0]
            m = (jax.random.bernoulli(
                keys[3 * i], p=0.6,
                shape=(int(in_features), int(np.sum(orig[:-1])))
            )).astype(jnp.float32)
            mask = jnp.repeat(m, neuronnum, axis=1)

        bound = 1.0 / np.sqrt(ins)
        w = jax.random.uniform(keys[3 * i + 1], (outs, ins),
                               minval=-bound, maxval=bound, dtype=jnp.float32)
        b = jax.random.uniform(keys[3 * i + 2], (1, outs),
                               minval=-bound, maxval=bound, dtype=jnp.float32)
        # __init__: weight = clamp(weight * mask, min=0)  (pos_weights=True)
        w = jnp.clip(w * mask, 0.0, None)
        params.append((jnp.asarray(w.T), b))  # store as (ins, outs)
    return params


# --------------------------------- main -----------------------------------

if __name__ == "__main__":
    # Small synthetic ontology: term counts per layer (last entry's out-dim is
    # unused by the final layer, exactly as in the PyTorch module).
    orig_layer_dims = [4, 2, 3, 5]
    neuronnum = 3
    in_features = 32                              # number of reconstructed genes
    latent_dim = orig_layer_dims[0] * neuronnum   # 12 (root layer == latent layer)
    batch = 2

    key = jax.random.PRNGKey(0)
    k_params, k_z = jax.random.split(key)

    params = build_onto_decoder_params(k_params, in_features, orig_layer_dims, neuronnum)
    z = jax.random.normal(k_z, (batch, latent_dim), dtype=jnp.float32)

    def run(single_buffer_consts):
        fn = jax.jit(lambda zz: onto_decoder_forward(
            zz, params, single_buffer_consts=single_buffer_consts))
        return jax.block_until_ready(fn(z))

    try:
        out = run(True)
    except Exception:
        # Fallback if this JAX/Mosaic build rejects pipeline_mode=pl.Buffered(1)
        # on the grid-invariant hidden-weight BlockSpecs.
        out = run(False)

    ref = onto_decoder_forward_ref(z, params)
    assert out.shape == (batch, in_features), out.shape
    # Final reconstruction matmul deliberately runs with bf16 inputs / f32
    # accumulation (per performance review); hidden chain stays f32 HIGHEST.
    assert jnp.allclose(out, ref, rtol=3e-2, atol=3e-2), "mismatch vs JAX reference"

    # TODO(synk): BatchNorm1d / LayerNorm / activations / Dropout are disabled in
    # the default OntoDecoder config (use_*_norm=False, use_activation=False,
    # drop=0) and are therefore not emitted here.
    print("KERNEL_OK")
</pallas_src>

<mosaic_0001>
module attributes {stable_mosaic.version = 11 : i64} {
  func.func @kernel(%arg0: i32, %arg1: i32, %arg2: i32, %arg3: memref<8x128xf32, #tpu.memory_space<vmem>>, %arg4: memref<128x128xf32, #tpu.memory_space<vmem>>, %arg5: memref<1x128xf32, #tpu.memory_space<vmem>>, %arg6: memref<256x128xf32, #tpu.memory_space<vmem>>, %arg7: memref<1x128xf32, #tpu.memory_space<vmem>>, %arg8: memref<384x128xbf16, #tpu.memory_space<vmem>>, %arg9: memref<1x128xf32, #tpu.memory_space<vmem>>, %arg10: memref<8x128xf32, #tpu.memory_space<vmem>>, %arg11: memref<8x384xf32, #tpu.memory_space<vmem>>) attributes {dimension_semantics = [#tpu.dimension_semantics<parallel>, #tpu.dimension_semantics<parallel>, #tpu.dimension_semantics<arbitrary>], iteration_bounds = array<i64: 1, 1, 1>, scalar_prefetch = 0 : i64, scratch_operands = 1 : i64, tpu.core_type = #tpu.core_type<tc>, window_params = [{transform_indices = @transform_0, window_bounds = array<i64: 8, 128>}, {pipeline_mode = #tpu.pipeline_mode<synchronous>, transform_indices = @transform_1, window_bounds = array<i64: 128, 128>}, {pipeline_mode = #tpu.pipeline_mode<synchronous>, transform_indices = @transform_2, window_bounds = array<i64: 1, 128>}, {pipeline_mode = #tpu.pipeline_mode<synchronous>, transform_indices = @transform_3, window_bounds = array<i64: 256, 128>}, {pipeline_mode = #tpu.pipeline_mode<synchronous>, transform_indices = @transform_4, window_bounds = array<i64: 1, 128>}, {transform_indices = @transform_5, window_bounds = array<i64: 384, 128>}, {transform_indices = @transform_6, window_bounds = array<i64: 1, 128>}, {transform_indices = @transform_7, window_bounds = array<i64: 8, 128>}]} {
    %c0_i32 = arith.constant 0 : i32
    %0 = arith.cmpi eq, %arg2, %c0_i32 : i32
    %1 = arith.extui %0 : i1 to i32
    %c0_i32_0 = arith.constant 0 : i32
    %2 = arith.cmpi ne, %1, %c0_i32_0 : i32
    scf.if %2 {
      %c0_8 = arith.constant 0 : index
      %c0_9 = arith.constant 0 : index
      %11 = vector.load %arg3[%c0_8, %c0_9] : memref<8x128xf32, #tpu.memory_space<vmem>>, vector<8x128xf32>
      %c0_10 = arith.constant 0 : index
      %c256 = arith.constant 256 : index
      %12 = vector.load %arg11[%c0_10, %c256] : memref<8x384xf32, #tpu.memory_space<vmem>>, vector<8x128xf32>
      tpu.vector_store %arg11[%c0_10, %c256], %11 {strides = array<i32>} : memref<8x384xf32, #tpu.memory_space<vmem>>, vector<8x128xf32>,
      %c0_11 = arith.constant 0 : index
      %c256_12 = arith.constant 256 : index
      %13 = vector.load %arg11[%c0_11, %c256_12] : memref<8x384xf32, #tpu.memory_space<vmem>>, vector<8x128xf32>
      %c0_13 = arith.constant 0 : index
      %c0_14 = arith.constant 0 : index
      %14 = vector.load %arg4[%c0_13, %c0_14] : memref<128x128xf32, #tpu.memory_space<vmem>>, vector<128x128xf32>
      %cst_15 = arith.constant dense<0.000000e+00> : vector<8x128xf32>
      %15 = tpu.matmul %13, %14, %cst_15 {dimension_numbers = #tpu.dot_dimension_numbers<[1], [0], [0], [1], [0, 0, 1, 1], [], []>, precision = #tpu.contract_precision<fp32>} : vector<8x128xf32>, vector<128x128xf32>, vector<8x128xf32> -> vector<8x128xf32>
      %c0_16 = arith.constant 0 : index
      %c0_17 = arith.constant 0 : index
      %16 = vector.load %arg5[%c0_16, %c0_17] : memref<1x128xf32, #tpu.memory_space<vmem>>, vector<1x128xf32>
      %17 = vector.broadcast %16 : vector<1x128xf32> to vector<8x128xf32>
      %18 = arith.addf %15, %17 : vector<8x128xf32>
      %c0_18 = arith.constant 0 : index
      %c128 = arith.constant 128 : index
      %19 = vector.load %arg11[%c0_18, %c128] : memref<8x384xf32, #tpu.memory_space<vmem>>, vector<8x128xf32>
      tpu.vector_store %arg11[%c0_18, %c128], %18 {strides = array<i32>} : memref<8x384xf32, #tpu.memory_space<vmem>>, vector<8x128xf32>,
      %c0_19 = arith.constant 0 : index
      %c128_20 = arith.constant 128 : index
      %20 = vector.load %arg11[%c0_19, %c128_20] : memref<8x384xf32, #tpu.memory_space<vmem>>, vector<8x256xf32>
      %c0_21 = arith.constant 0 : index
      %c0_22 = arith.constant 0 : index
      %21 = vector.load %arg6[%c0_21, %c0_22] : memref<256x128xf32, #tpu.memory_space<vmem>>, vector<256x128xf32>
      %cst_23 = arith.constant dense<0.000000e+00> : vector<8x128xf32>
      %22 = tpu.matmul %20, %21, %cst_23 {dimension_numbers = #tpu.dot_dimension_numbers<[1], [0], [0], [1], [0, 0, 1, 1], [], []>, precision = #tpu.contract_precision<fp32>} : vector<8x256xf32>, vector<256x128xf32>, vector<8x128xf32> -> vector<8x128xf32>
      %c0_24 = arith.constant 0 : index
      %c0_25 = arith.constant 0 : index
      %23 = vector.load %arg7[%c0_24, %c0_25] : memref<1x128xf32, #tpu.memory_space<vmem>>, vector<1x128xf32>
      %24 = vector.broadcast %23 : vector<1x128xf32> to vector<8x128xf32>
      %25 = arith.addf %22, %24 : vector<8x128xf32>
      %c0_26 = arith.constant 0 : index
      %c0_27 = arith.constant 0 : index
      %26 = vector.load %arg11[%c0_26, %c0_27] : memref<8x384xf32, #tpu.memory_space<vmem>>, vector<8x128xf32>
      tpu.vector_store %arg11[%c0_26, %c0_27], %25 {strides = array<i32>} : memref<8x384xf32, #tpu.memory_space<vmem>>, vector<8x128xf32>,
    } else {
    }
    %c0 = arith.constant 0 : index
    %c0_1 = arith.constant 0 : index
    %3 = vector.load %arg11[%c0, %c0_1] : memref<8x384xf32, #tpu.memory_space<vmem>>, vector<8x384xf32>
    %4 = arith.truncf %3 : vector<8x384xf32> to vector<8x384xbf16>
    %c0_2 = arith.constant 0 : index
    %c0_3 = arith.constant 0 : index
    %5 = vector.load %arg8[%c0_2, %c0_3] : memref<384x128xbf16, #tpu.memory_space<vmem>>, vector<384x128xbf16>
    %cst = arith.constant dense<0.000000e+00> : vector<8x128xf32>
    %6 = tpu.matmul %4, %5, %cst {dimension_numbers = #tpu.dot_dimension_numbers<[1], [0], [0], [1], [0, 0, 1, 1], [], []>} : vector<8x384xbf16>, vector<384x128xbf16>, vector<8x128xf32> -> vector<8x128xf32>
    %c0_4 = arith.constant 0 : index
    %c0_5 = arith.constant 0 : index
    %7 = vector.load %arg9[%c0_4, %c0_5] : memref<1x128xf32, #tpu.memory_space<vmem>>, vector<1x128xf32>
    %8 = vector.broadcast %7 : vector<1x128xf32> to vector<8x128xf32>
    %9 = arith.addf %6, %8 : vector<8x128xf32>
    %c0_6 = arith.constant 0 : index
    %c0_7 = arith.constant 0 : index
    %10 = vector.load %arg10[%c0_6, %c0_7] : memref<8x128xf32, #tpu.memory_space<vmem>>, vector<8x128xf32>
    tpu.vector_store %arg10[%c0_6, %c0_7], %9 {strides = array<i32>} : memref<8x128xf32, #tpu.memory_space<vmem>>, vector<8x128xf32>,
    return
  }
  func.func @transform_0(%arg0: i32, %arg1: i32, %arg2: i32) -> (i32, i32) {
    %c0_i32 = arith.constant 0 : i32
    %c0_i32_0 = arith.constant 0 : i32
    return %arg0, %c0_i32 : i32, i32
  }
  func.func @transform_1(%arg0: i32, %arg1: i32, %arg2: i32) -> (i32, i32) {
    %c0_i32 = arith.constant 0 : i32
    %c0_i32_0 = arith.constant 0 : i32
    %c0_i32_1 = arith.constant 0 : i32
    return %c0_i32, %c0_i32_0 : i32, i32
  }
  func.func @transform_2(%arg0: i32, %arg1: i32, %arg2: i32) -> (i32, i32) {
    %c0_i32 = arith.constant 0 : i32
    %c0_i32_0 = arith.constant 0 : i32
    %c0_i32_1 = arith.constant 0 : i32
    return %c0_i32, %c0_i32_0 : i32, i32
  }
  func.func @transform_3(%arg0: i32, %arg1: i32, %arg2: i32) -> (i32, i32) {
    %c0_i32 = arith.constant 0 : i32
    %c0_i32_0 = arith.constant 0 : i32
    %c0_i32_1 = arith.constant 0 : i32
    return %c0_i32, %c0_i32_0 : i32, i32
  }
  func.func @transform_4(%arg0: i32, %arg1: i32, %arg2: i32) -> (i32, i32) {
    %c0_i32 = arith.constant 0 : i32
    %c0_i32_0 = arith.constant 0 : i32
    %c0_i32_1 = arith.constant 0 : i32
    return %c0_i32, %c0_i32_0 : i32, i32
  }
  func.func @transform_5(%arg0: i32, %arg1: i32, %arg2: i32) -> (i32, i32) {
    %c1_i32 = arith.constant 1 : i32
    %0 = arith.muli %arg1, %c1_i32 : i32
    %1 = arith.addi %0, %arg2 : i32
    %c0_i32 = arith.constant 0 : i32
    %c0_i32_0 = arith.constant 0 : i32
    return %c0_i32, %1 : i32, i32
  }
  func.func @transform_6(%arg0: i32, %arg1: i32, %arg2: i32) -> (i32, i32) {
    %c1_i32 = arith.constant 1 : i32
    %0 = arith.muli %arg1, %c1_i32 : i32
    %1 = arith.addi %0, %arg2 : i32
    %c0_i32 = arith.constant 0 : i32
    %c0_i32_0 = arith.constant 0 : i32
    return %c0_i32, %1 : i32, i32
  }
  func.func @transform_7(%arg0: i32, %arg1: i32, %arg2: i32) -> (i32, i32) {
    %c1_i32 = arith.constant 1 : i32
    %0 = arith.muli %arg1, %c1_i32 : i32
    %1 = arith.addi %0, %arg2 : i32
    %c0_i32 = arith.constant 0 : i32
    return %arg0, %1 : i32, i32
  }
}

module attributes {stable_mosaic.version = 11 : i64} {
  func.func @kernel(%arg0: i32, %arg1: i32, %arg2: i32, %arg3: memref<8x128xf32, #tpu.memory_space<vmem>>, %arg4: memref<128x128xf32, #tpu.memory_space<vmem>>, %arg5: memref<1x128xf32, #tpu.memory_space<vmem>>, %arg6: memref<256x128xf32, #tpu.memory_space<vmem>>, %arg7: memref<1x128xf32, #tpu.memory_space<vmem>>, %arg8: memref<384x128xbf16, #tpu.memory_space<vmem>>, %arg9: memref<1x128xf32, #tpu.memory_space<vmem>>, %arg10: memref<8x128xf32, #tpu.memory_space<vmem>>, %arg11: memref<8x384xf32, #tpu.memory_space<vmem>>) attributes {dimension_semantics = [#tpu.dimension_semantics<parallel>, #tpu.dimension_semantics<parallel>, #tpu.dimension_semantics<arbitrary>], iteration_bounds = array<i64: 1, 1, 1>, scalar_prefetch = 0 : i64, scratch_operands = 1 : i64, tpu.core_type = #tpu.core_type<tc>, window_params = [{transform_indices = @transform_0, window_bounds = array<i64: 8, 128>}, {pipeline_mode = #tpu.pipeline_mode<synchronous>, transform_indices = @transform_1, window_bounds = array<i64: 128, 128>}, {pipeline_mode = #tpu.pipeline_mode<synchronous>, transform_indices = @transform_2, window_bounds = array<i64: 1, 128>}, {pipeline_mode = #tpu.pipeline_mode<synchronous>, transform_indices = @transform_3, window_bounds = array<i64: 256, 128>}, {pipeline_mode = #tpu.pipeline_mode<synchronous>, transform_indices = @transform_4, window_bounds = array<i64: 1, 128>}, {transform_indices = @transform_5, window_bounds = array<i64: 384, 128>}, {transform_indices = @transform_6, window_bounds = array<i64: 1, 128>}, {transform_indices = @transform_7, window_bounds = array<i64: 8, 128>}]} {
    %c0_i32 = arith.constant 0 : i32
    %0 = arith.cmpi eq, %arg2, %c0_i32 : i32
    %1 = arith.extui %0 : i1 to i32
    %c0_i32_0 = arith.constant 0 : i32
    %2 = arith.cmpi ne, %1, %c0_i32_0 : i32
    scf.if %2 {
      %c0_8 = arith.constant 0 : index
      %c0_9 = arith.constant 0 : index
      %11 = vector.load %arg3[%c0_8, %c0_9] : memref<8x128xf32, #tpu.memory_space<vmem>>, vector<8x128xf32>
      %c0_10 = arith.constant 0 : index
      %c256 = arith.constant 256 : index
      %12 = vector.load %arg11[%c0_10, %c256] : memref<8x384xf32, #tpu.memory_space<vmem>>, vector<8x128xf32>
      tpu.vector_store %arg11[%c0_10, %c256], %11 {strides = array<i32>} : memref<8x384xf32, #tpu.memory_space<vmem>>, vector<8x128xf32>,
      %c0_11 = arith.constant 0 : index
      %c256_12 = arith.constant 256 : index
      %13 = vector.load %arg11[%c0_11, %c256_12] : memref<8x384xf32, #tpu.memory_space<vmem>>, vector<8x128xf32>
      %c0_13 = arith.constant 0 : index
      %c0_14 = arith.constant 0 : index
      %14 = vector.load %arg4[%c0_13, %c0_14] : memref<128x128xf32, #tpu.memory_space<vmem>>, vector<128x128xf32>
      %cst_15 = arith.constant dense<0.000000e+00> : vector<8x128xf32>
      %15 = tpu.matmul %13, %14, %cst_15 {dimension_numbers = #tpu.dot_dimension_numbers<[1], [0], [0], [1], [0, 0, 1, 1], [], []>, precision = #tpu.contract_precision<fp32>} : vector<8x128xf32>, vector<128x128xf32>, vector<8x128xf32> -> vector<8x128xf32>
      %c0_16 = arith.constant 0 : index
      %c0_17 = arith.constant 0 : index
      %16 = vector.load %arg5[%c0_16, %c0_17] : memref<1x128xf32, #tpu.memory_space<vmem>>, vector<1x128xf32>
      %17 = vector.broadcast %16 : vector<1x128xf32> to vector<8x128xf32>
      %18 = arith.addf %15, %17 : vector<8x128xf32>
      %c0_18 = arith.constant 0 : index
      %c128 = arith.constant 128 : index
      %19 = vector.load %arg11[%c0_18, %c128] : memref<8x384xf32, #tpu.memory_space<vmem>>, vector<8x128xf32>
      tpu.vector_store %arg11[%c0_18, %c128], %18 {strides = array<i32>} : memref<8x384xf32, #tpu.memory_space<vmem>>, vector<8x128xf32>,
      %c0_19 = arith.constant 0 : index
      %c128_20 = arith.constant 128 : index
      %20 = vector.load %arg11[%c0_19, %c128_20] : memref<8x384xf32, #tpu.memory_space<vmem>>, vector<8x256xf32>
      %c0_21 = arith.constant 0 : index
      %c0_22 = arith.constant 0 : index
      %21 = vector.load %arg6[%c0_21, %c0_22] : memref<256x128xf32, #tpu.memory_space<vmem>>, vector<256x128xf32>
      %cst_23 = arith.constant dense<0.000000e+00> : vector<8x128xf32>
      %22 = tpu.matmul %20, %21, %cst_23 {dimension_numbers = #tpu.dot_dimension_numbers<[1], [0], [0], [1], [0, 0, 1, 1], [], []>, precision = #tpu.contract_precision<fp32>} : vector<8x256xf32>, vector<256x128xf32>, vector<8x128xf32> -> vector<8x128xf32>
      %c0_24 = arith.constant 0 : index
      %c0_25 = arith.constant 0 : index
      %23 = vector.load %arg7[%c0_24, %c0_25] : memref<1x128xf32, #tpu.memory_space<vmem>>, vector<1x128xf32>
      %24 = vector.broadcast %23 : vector<1x128xf32> to vector<8x128xf32>
      %25 = arith.addf %22, %24 : vector<8x128xf32>
      %c0_26 = arith.constant 0 : index
      %c0_27 = arith.constant 0 : index
      %26 = vector.load %arg11[%c0_26, %c0_27] : memref<8x384xf32, #tpu.memory_space<vmem>>, vector<8x128xf32>
      tpu.vector_store %arg11[%c0_26, %c0_27], %25 {strides = array<i32>} : memref<8x384xf32, #tpu.memory_space<vmem>>, vector<8x128xf32>,
    } else {
    }
    %c0 = arith.constant 0 : index
    %c0_1 = arith.constant 0 : index
    %3 = vector.load %arg11[%c0, %c0_1] : memref<8x384xf32, #tpu.memory_space<vmem>>, vector<8x384xf32>
    %4 = arith.truncf %3 : vector<8x384xf32> to vector<8x384xbf16>
    %c0_2 = arith.constant 0 : index
    %c0_3 = arith.constant 0 : index
    %5 = vector.load %arg8[%c0_2, %c0_3] : memref<384x128xbf16, #tpu.memory_space<vmem>>, vector<384x128xbf16>
    %cst = arith.constant dense<0.000000e+00> : vector<8x128xf32>
    %6 = tpu.matmul %4, %5, %cst {dimension_numbers = #tpu.dot_dimension_numbers<[1], [0], [0], [1], [0, 0, 1, 1], [], []>} : vector<8x384xbf16>, vector<384x128xbf16>, vector<8x128xf32> -> vector<8x128xf32>
    %c0_4 = arith.constant 0 : index
    %c0_5 = arith.constant 0 : index
    %7 = vector.load %arg9[%c0_4, %c0_5] : memref<1x128xf32, #tpu.memory_space<vmem>>, vector<1x128xf32>
    %8 = vector.broadcast %7 : vector<1x128xf32> to vector<8x128xf32>
    %9 = arith.addf %6, %8 : vector<8x128xf32>
    %c0_6 = arith.constant 0 : index
    %c0_7 = arith.constant 0 : index
    %10 = vector.load %arg10[%c0_6, %c0_7] : memref<8x128xf32, #tpu.memory_space<vmem>>, vector<8x128xf32>
    tpu.vector_store %arg10[%c0_6, %c0_7], %9 {strides = array<i32>} : memref<8x128xf32, #tpu.memory_space<vmem>>, vector<8x128xf32>,
    return
  }
  func.func @transform_0(%arg0: i32, %arg1: i32, %arg2: i32) -> (i32, i32) {
    %c0_i32 = arith.constant 0 : i32
    %c0_i32_0 = arith.constant 0 : i32
    return %arg0, %c0_i32 : i32, i32
  }
  func.func @transform_1(%arg0: i32, %arg1: i32, %arg2: i32) -> (i32, i32) {
    %c0_i32 = arith.constant 0 : i32
    %c0_i32_0 = arith.constant 0 : i32
    %c0_i32_1 = arith.constant 0 : i32
    return %c0_i32, %c0_i32_0 : i32, i32
  }
  func.func @transform_2(%arg0: i32, %arg1: i32, %arg2: i32) -> (i32, i32) {
    %c0_i32 = arith.constant 0 : i32
    %c0_i32_0 = arith.constant 0 : i32
    %c0_i32_1 = arith.constant 0 : i32
    return %c0_i32, %c0_i32_0 : i32, i32
  }
  func.func @transform_3(%arg0: i32, %arg1: i32, %arg2: i32) -> (i32, i32) {
    %c0_i32 = arith.constant 0 : i32
    %c0_i32_0 = arith.constant 0 : i32
    %c0_i32_1 = arith.constant 0 : i32
    return %c0_i32, %c0_i32_0 : i32, i32
  }
  func.func @transform_4(%arg0: i32, %arg1: i32, %arg2: i32) -> (i32, i32) {
    %c0_i32 = arith.constant 0 : i32
    %c0_i32_0 = arith.constant 0 : i32
    %c0_i32_1 = arith.constant 0 : i32
    return %c0_i32, %c0_i32_0 : i32, i32
  }
  func.func @transform_5(%arg0: i32, %arg1: i32, %arg2: i32) -> (i32, i32) {
    %c1_i32 = arith.constant 1 : i32
    %0 = arith.muli %arg1, %c1_i32 : i32
    %1 = arith.addi %0, %arg2 : i32
    %c0_i32 = arith.constant 0 : i32
    %c0_i32_0 = arith.constant 0 : i32
    return %c0_i32, %1 : i32, i32
  }
  func.func @transform_6(%arg0: i32, %arg1: i32, %arg2: i32) -> (i32, i32) {
    %c1_i32 = arith.constant 1 : i32
    %0 = arith.muli %arg1, %c1_i32 : i32
    %1 = arith.addi %0, %arg2 : i32
    %c0_i32 = arith.constant 0 : i32
    %c0_i32_0 = arith.constant 0 : i32
    return %c0_i32, %1 : i32, i32
  }
  func.func @transform_7(%arg0: i32, %arg1: i32, %arg2: i32) -> (i32, i32) {
    %c1_i32 = arith.constant 1 : i32
    %0 = arith.muli %arg1, %c1_i32 : i32
    %1 = arith.addi %0, %arg2 : i32
    %c0_i32 = arith.constant 0 : i32
    return %arg0, %1 : i32, i32
  }
}

</mosaic_0001>

<bundles_post_ra>
// kernel: _lambda_.1
= control target key start
LH: loop header
LB: loop body
LE: loop exit
PB: predicated region body
PF: predicated region fallthrough
CT: control target
= control target key end

     0   :  { %12 = vsyncpa [#allocation4], 0  ;;  %s2458_s0 = inlined_call_operand.vmem [shape: f32[8,128], index: 0, kind: input, shape index: {}]   ;;  %s2459_s1 = inlined_call_operand.hbm [shape: f32[128,128], index: 1, kind: input, shape index: {}]   ;;  %s2460_s2 = inlined_call_operand.vmem [shape: f32[1,128], index: 2, kind: input, shape index: {}]   ;;  %s2461_s3 = inlined_call_operand.hbm [shape: f32[256,128], index: 3, kind: input, shape index: {}]   ;;  %s2462_s4 = inlined_call_operand.vmem [shape: f32[1,128], index: 4, kind: input, shape index: {}]   ;;  %s2463_s5 = inlined_call_operand.hbm [shape: bf16[384,128], index: 5, kind: input, shape index: {}]   ;;  %s2464_s6 = inlined_call_operand.vmem [shape: f32[1,128], index: 6, kind: input, shape index: {}]   ;;  %s2465_s7 = inlined_call_operand.vmem [shape: f32[8,128], index: 7, kind: output, shape index: {}]  }
   0x1   :  { %13 = vsyncpa [#allocation6], 0  ;;  %s35_s26 = sshll.u32 %s2461_s3, 4  ;;  %s1669_s27 = smov [#allocation5]   ;;  %s36_s26 = int_to_ptr.hbm [resolvable:$true] %s35_s26 }
   0x2   :  { %s37_s28 = sshll.u32 %s1669_s27, 4  ;;  %s20_s8 = sshll.u32 %s2459_s1, 4  ;;  %s38_s28 = int_to_ptr.vmem [resolvable:$true] %s37_s28  ;;  %s21_s8 = int_to_ptr.hbm [resolvable:$true] %s20_s8 }
   0x3   :  { %s1670_s9 = smov 128   ;;  %s1671_s10 = smov 8  }
   0x4   :  { %43 = dma.hbm_to_vmem [thread:$0]  %s36_s26, 4096, %s38_s28, [#allocation6], %s1670_s9, %s1670_s9, %s1671_s10  }
   0x5   :  { %s1672_s11 = smov [#allocation3]   ;;  %s53_s15 = sshll.u32 %s2463_s5, 4  ;;  %s54_s15 = int_to_ptr.hbm [resolvable:$true] %s53_s15 }
   0x6   :  { %s22_s12 = sshll.u32 %s1672_s11, 4  ;;  %s1673_s3 = smov [#allocation7]   ;;  %s23_s12 = int_to_ptr.vmem [resolvable:$true] %s22_s12 }
   0x7   :  { %28 = dma.hbm_to_vmem [thread:$0]  %s21_s8, 2048, %s23_s12, [#allocation4], %s1670_s9, %s1670_s9, %s1671_s10  }
   0x8   :  { %s55_s16 = sshll.u32 %s1673_s3, 4  ;;  %s1674_s17 = smov 64   ;;  %s56_s16 = int_to_ptr.vmem [resolvable:$true] %s55_s16 }
   0x9   :  { %s1675_s18 = smov 4  }
   0xa   :  { %61 = dma.hbm_to_vmem [thread:$0]  %s54_s15, 3072, %s56_s16, [#allocation6], %s1674_s17, %s1674_s17, %s1675_s18  }
   0xb   :  { %1665 = dma.done.wait [#allocation4], 2048  }
   0xc   :  { %1666 = vsyncadd [#allocation4], 4294965248 }
   0xd   :  { %1667 = dma.done.wait [#allocation6], 7168  }
   0xe   :  { %1668 = vsyncadd [#allocation6], 4294960128  ;;  %v124_v0 = vld [vmem:[#allocation3 + $0x78] sm:$0xff]  ;;  %v123_v1 = vld [vmem:[#allocation3 + $0x70] sm:$0xff] }
   0xf   :  { %v122_v2 = vld [vmem:[#allocation3 + $0x68] sm:$0xff]  ;;  %v1725_v3 = vand.u32 4294901760, %v124_v0  ;;  %v1727_v4 = vand.u32 4294901760, %v123_v1  ;;  %v121_v5 = vld [vmem:[#allocation3 + $0x60] sm:$0xff]  ;;  %v120_v8 = vld [vmem:[#allocation3 + $0x58] sm:$0xff] }
  0x10   :  { %v1730_v6 = vand.u32 4294901760, %v122_v2  ;;  %v1740_v10 = vand.u32 4294901760, %v121_v5  ;;  %v119_v11 = vld [vmem:[#allocation3 + $0x50] sm:$0xff]  ;;  %v1749_v14 = vand.u32 4294901760, %v120_v8  ;;  %v118_v15 = vld [vmem:[#allocation3 + $0x48] sm:$0xff]  ;;  %v117_v19 = vld [vmem:[#allocation3 + $0x40] sm:$0xff] }
  0x11   :  { %130 = vmatpush.msra.mxu1 %v1725_v3  ;;  %v1733_v7 = vsub.f32 %v124_v0, %v1725_v3  ;;  %326 = vmatpush.msra.mxu3 %v1725_v3  ;;  %v1737_v9 = vsub.f32 %v123_v1, %v1727_v4  ;;  %v1760_v18 = vand.u32 4294901760, %v119_v11  ;;  %v1771_v22 = vand.u32 4294901760, %v118_v15  ;;  %v116_v23 = vld [vmem:[#allocation3 + $0x38] sm:$0xff]  ;;  %v115_v27 = vld [vmem:[#allocation3 + $0x30] sm:$0xff]  ;;  %v114_v31 = vld [vmem:[#allocation3 + $0x28] sm:$0xff] }
  0x12   :  { %v1745_v13 = vsub.f32 %v122_v2, %v1730_v6  ;;  %v1754_v17 = vsub.f32 %v121_v5, %v1740_v10  ;;  %v1765_v21 = vsub.f32 %v120_v8, %v1749_v14  ;;  %v1782_v26 = vand.u32 4294901760, %v117_v19  ;;  %v106_v34 = vld [vmem:[%s2458_s0] sm:$0xff]  ;;  %v112_v42 = vld [vmem:[#allocation3 + $0x18] sm:$0xff]  ;;  %v111_v46 = vld [vmem:[#allocation3 + $0x10] sm:$0xff] }
  0x13   :  { %132 = vmatpush.msra.mxu1 %v1727_v4  ;;  %273 = vmatpush.msra.mxu2 %v1733_v7  ;;  %v172_v12 = vand.u32 4294901760, %v1733_v7  ;;  %v178_v16 = vand.u32 4294901760, %v1737_v9  ;;  %v1776_v25 = vsub.f32 %v119_v11, %v1760_v18  ;;  %v1787_v29 = vsub.f32 %v118_v15, %v1771_v22  ;;  %v113_v37 = vld [vmem:[#allocation3 + $0x20] sm:$0xff]  ;;  %v110_v51 = vld [vmem:[#allocation3 + $0x8] sm:$0xff] }
  0x14   :  { %328 = vmatpush.msra.mxu3 %v1727_v4  ;;  %v184_v20 = vand.u32 4294901760, %v1745_v13  ;;  %v190_v24 = vand.u32 4294901760, %v1754_v17  ;;  %v196_v28 = vand.u32 4294901760, %v1765_v21  ;;  %v1793_v30 = vand.u32 4294901760, %v116_v23  ;;  %v109_v55 = vld [vmem:[#allocation3] sm:$0xff] }
  0x15   :  { %134 = vmatpush.msra.mxu1 %v1730_v6  ;;  %276 = vmatpush.msra.mxu2 %v1737_v9  ;;  %v202_v32 = vand.u32 4294901760, %v1776_v25  ;;  %v1798_v33 = vsub.f32 %v117_v19, %v1782_v26  ;;  %v1807_v35 = vand.u32 4294901760, %v115_v27  ;;  %v1810_v36 = vand.u32 4294901760, %v106_v34 }
  0x16   :  { %330 = vmatpush.msra.mxu3 %v1730_v6  ;;  %367 = vmatpush.msra.mxu0 %v172_v12  ;;  %v208_v38 = vand.u32 4294901760, %v1787_v29  ;;  %v1814_v39 = vsub.f32 %v116_v23, %v1793_v30  ;;  %v1820_v40 = vand.u32 4294901760, %v114_v31  ;;  %v1834_v45 = vand.u32 4294901760, %v113_v37 }
  0x17   :  { %136 = vmatpush.msra.mxu1 %v1740_v10  ;;  %279 = vmatpush.msra.mxu2 %v1745_v13  ;;  %v1824_v41 = vsub.f32 %v106_v34, %v1810_v36  ;;  %v214_v43 = vand.u32 4294901760, %v1798_v33  ;;  %v1828_v44 = vsub.f32 %v115_v27, %v1807_v35  ;;  %v1845_v49 = vand.u32 4294901760, %v112_v42 }
  0x18   :  { %332 = vmatpush.msra.mxu3 %v1740_v10  ;;  %371 = vmatpush.msra.mxu0 %v178_v16  ;;  %v220_v47 = vand.u32 4294901760, %v1814_v39  ;;  %v1839_v48 = vsub.f32 %v114_v31, %v1820_v40  ;;  %v1853_v53 = vsub.f32 %v113_v37, %v1834_v45  ;;  %v1859_v54 = vand.u32 4294901760, %v111_v46 }
  0x19   :  { %138 = vmatpush.msra.mxu1 %v1749_v14  ;;  %282 = vmatpush.msra.mxu2 %v1754_v17  ;;  %v1849_v50 = vand.u32 4294901760, %v1824_v41  ;;  %v226_v52 = vand.u32 4294901760, %v1828_v44  ;;  %v173_v56 = vsub.f32 %v1733_v7, %v172_v12  ;;  %v1867_v58 = vsub.f32 %v112_v42, %v1845_v49 }
  0x1a   :  { %334 = vmatpush.msra.mxu3 %v1749_v14  ;;  %375 = vmatpush.msra.mxu0 %v184_v20  ;;  %v232_v57 = vand.u32 4294901760, %v1839_v48  ;;  %v1873_v59 = vand.u32 4294901760, %v110_v51  ;;  %v179_v61 = vsub.f32 %v1737_v9, %v178_v16  ;;  %v238_v62 = vand.u32 4294901760, %v1853_v53 }
  0x1b   :  { %140 = vmatpush.msra.mxu1 %v1760_v18  ;;  %285 = vmatpush.msra.mxu2 %v1765_v21  ;;  %v164_v60 = vsub.f32 %v1824_v41, %v1849_v50  ;;  %v1886_v63 = vand.u32 4294901760, %v109_v55  ;;  %v249_v0 = vsub.f32 %v111_v46, %v1859_v54  ;;  %v174_v1 = vand.u32 4294901760, %v173_v56  ;;  %v487_v56 = vld [vmem:[#allocation5 + $0x70] sm:$0xff] }
  0x1c   :  { %336 = vmatpush.msra.mxu3 %v1760_v18  ;;  %379 = vmatpush.msra.mxu0 %v190_v24  ;;  %v185_v2 = vsub.f32 %v1745_v13, %v184_v20  ;;  %v244_v5 = vand.u32 4294901760, %v1867_v58  ;;  %v255_v8 = vsub.f32 %v110_v51, %v1873_v59  ;;  %v180_v9 = vand.u32 4294901760, %v179_v61 }
  0x1d   :  { %142 = vmatpush.msra.mxu1 %v1771_v22  ;;  %288 = vmatpush.msra.mxu2 %v1776_v25  ;;  %v1896_v7 = vand.u32 4294901760, %v164_v60  ;;  %v191_v11 = vsub.f32 %v1754_v17, %v190_v24  ;;  %v261_v12 = vsub.f32 %v109_v55, %v1886_v63  ;;  %v197_v15 = vsub.f32 %v1765_v21, %v196_v28 }
  0x1e   :  { %338 = vmatpush.msra.mxu3 %v1771_v22  ;;  %383 = vmatpush.msra.mxu0 %v196_v28  ;;  %v186_v13 = vand.u32 4294901760, %v185_v2  ;;  %v250_v16 = vand.u32 4294901760, %v249_v0  ;;  %v203_v19 = vsub.f32 %v1776_v25, %v202_v32  ;;  %v256_v20 = vand.u32 4294901760, %v255_v8 }
  0x1f   :  { %144 = vmatpush.msra.mxu1 %v1782_v26  ;;  %291 = vmatpush.msra.mxu2 %v1787_v29  ;;  %v192_v17 = vand.u32 4294901760, %v191_v11  ;;  %v198_v21 = vand.u32 4294901760, %v197_v15  ;;  %v209_v23 = vsub.f32 %v1787_v29, %v208_v38  ;;  %v262_v24 = vand.u32 4294901760, %v261_v12  ;;  %v481_v11 = vld [vmem:[#allocation5 + $0x40] sm:$0xff] }
  0x20   :  { %340 = vmatpush.msra.mxu3 %v1782_v26  ;;  %387 = vmatpush.msra.mxu0 %v202_v32  ;;  %v204_v27 = vand.u32 4294901760, %v203_v19  ;;  %v215_v25 = vsub.f32 %v1798_v33, %v214_v43  ;;  %v221_v31 = vsub.f32 %v1814_v39, %v220_v47  ;;  %v227_v29 = vsub.f32 %v1828_v44, %v226_v52 }
  0x21   :  { %146 = vmatpush.msra.mxu1 %v1793_v30  ;;  %294 = vmatpush.msra.mxu2 %v1798_v33  ;;  %v210_v28 = vand.u32 4294901760, %v209_v23  ;;  %v233_v33 = vsub.f32 %v1839_v48, %v232_v57  ;;  %v245_v42 = vsub.f32 %v1867_v58, %v244_v5  ;;  %v251_v46 = vsub.f32 %v249_v0, %v250_v16 }
  0x22   :  { %342 = vmatpush.msra.mxu3 %v1793_v30  ;;  %391 = vmatpush.msra.mxu0 %v208_v38  ;;  %v216_v32 = vand.u32 4294901760, %v215_v25  ;;  %v222_v34 = vand.u32 4294901760, %v221_v31  ;;  %v228_v37 = vand.u32 4294901760, %v227_v29  ;;  %v239_v38 = vsub.f32 %v1853_v53, %v238_v62  ;;  %v480_v29 = vld [vmem:[#allocation5 + $0x38] sm:$0xff] }
  0x23   :  { %148 = vmatpush.msra.mxu1 %v1807_v35  ;;  %297 = vmatpush.msra.mxu2 %v1814_v39  ;;  %v234_v39 = vand.u32 4294901760, %v233_v33  ;;  %v252_v51 = vand.u32 4294901760, %v251_v46  ;;  %v1936_v60 = vand.u32 4294901760, %v487_v56  ;;  %v1974_v23 = vand.u32 4294901760, %v481_v11 }
  0x24   :  { %344 = vmatpush.msra.mxu3 %v1807_v35  ;;  %395 = vmatpush.msra.mxu0 %v214_v43  ;;  %v240_v43 = vand.u32 4294901760, %v239_v38 }
  0x25   :  { %150 = vmatpush.msra.mxu1 %v1820_v40  ;;  %300 = vmatpush.msra.mxu2 %v1828_v44  ;;  %v257_v44 = vsub.f32 %v255_v8, %v256_v20  ;;  %v2001_v38 = vsub.f32 %v481_v11, %v1974_v23 }
  0x26   :  { %346 = vmatpush.msra.mxu3 %v1820_v40  ;;  %399 = vmatpush.msra.mxu0 %v220_v47  ;;  %v246_v47 = vand.u32 4294901760, %v245_v42 }
  0x27   :  { %152 = vmatpush.msra.mxu1 %v1834_v45  ;;  %303 = vmatpush.msra.mxu2 %v1839_v48  ;;  %v258_v55 = vand.u32 4294901760, %v257_v44  ;;  %v594_v44 = vand.u32 4294901760, %v2001_v38 }
  0x28   :  { %348 = vmatpush.msra.mxu3 %v1834_v45  ;;  %403 = vmatpush.msra.mxu0 %v226_v52  ;;  %v263_v52 = vsub.f32 %v261_v12, %v262_v24 }
  0x29   :  { %154 = vmatpush.msra.mxu1 %v1845_v49  ;;  %306 = vmatpush.msra.mxu2 %v1853_v53  ;;  %v488_v53 = vld [vmem:[#allocation5 + $0x78] sm:$0xff] }
  0x2a   :  { %350 = vmatpush.msra.mxu3 %v1845_v49  ;;  %407 = vmatpush.msra.mxu0 %v232_v57  ;;  %v264_v48 = vand.u32 4294901760, %v263_v52  ;;  %v486_v57 = vld [vmem:[#allocation5 + $0x68] sm:$0xff] }
  0x2b   :  { %156 = vmatpush.msra.mxu1 %v1859_v54  ;;  %309 = vmatpush.msra.mxu2 %v1867_v58  ;;  %v1934_v58 = vand.u32 4294901760, %v488_v53  ;;  %v1938_v61 = vand.u32 4294901760, %v486_v57 }
  0x2c   :  { %352 = vmatpush.msra.mxu3 %v1859_v54  ;;  %411 = vmatpush.msra.mxu0 %v238_v62  ;;  %v485_v62 = vld [vmem:[#allocation5 + $0x60] sm:$0xff] }
  0x2d   :  { %158 = vmatpush.msra.mxu1 %v1873_v59  ;;  %312 = vmatpush.msra.mxu2 %v249_v0  ;;  %v484_v0 = vld [vmem:[#allocation5 + $0x58] sm:$0xff]  ;;  %v1941_v2 = vand.u32 4294901760, %v485_v62 }
  0x2e   :  { %354 = vmatpush.msra.mxu3 %v1873_v59  ;;  %415 = vmatpush.msra.mxu0 %v244_v5  ;;  %v1943_v5 = vand.u32 4294901760, %v484_v0 }
  0x2f   :  { %160 = vmatpush.msra.mxu1 %v1886_v63  ;;  %315 = vmatpush.msra.mxu2 %v255_v8 }
  0x30   :  { %356 = vmatpush.msra.mxu3 %v1886_v63  ;;  %166 = vmatmul.f32.vlgmr.msra.gmra.mxu1 %v1896_v7 }
  0x31   :  { %175 = vmatpush.msrb.mxu1 %v174_v1  ;;  %318 = vmatpush.msra.mxu2 %v261_v12  ;;  %v483_v1 = vld [vmem:[#allocation5 + $0x50] sm:$0xff]  ;;  %v1952_v12 = vsub.f32 %v487_v56, %v1936_v60 }
  0x32   :  { %321 = vmatmul.f32.vlgmr.msra.gmra.mxu2 %v1824_v41  ;;  %360 = vmatmul.f32.vlgmr.msra.gmra.mxu3 %v1849_v50  ;;  %v1945_v8 = vand.u32 4294901760, %v483_v1 }
  0x33   :  { %181 = vmatpush.msrb.mxu1 %v180_v9  ;;  %419 = vmatpush.msra.mxu0 %v250_v16  ;;  %v482_v9 = vld [vmem:[#allocation5 + $0x48] sm:$0xff]  ;;  %v1961_v16 = vsub.f32 %v485_v62, %v1941_v2 }
  0x34   :  { %510 = vmatpush.msrb.mxu2 %v1934_v58  ;;  %v1958_v15 = vand.u32 4294901760, %v482_v9 }
  0x35   :  { %187 = vmatpush.msrb.mxu1 %v186_v13  ;;  %423 = vmatpush.msra.mxu0 %v256_v20  ;;  %v1955_v13 = vsub.f32 %v486_v57, %v1938_v61  ;;  %v558_v20 = vand.u32 4294901760, %v1952_v12 }
  0x36   :  { %512 = vmatpush.msrb.mxu2 %v1936_v60 }
  0x37   :  { %193 = vmatpush.msrb.mxu1 %v192_v17  ;;  %427 = vmatpush.msra.mxu0 %v262_v24  ;;  %v1964_v17 = vsub.f32 %v484_v0, %v1943_v5  ;;  %v570_v24 = vand.u32 4294901760, %v1961_v16  ;;  %v559_v25 = vsub.f32 %v1952_v12, %v558_v20 }
  0x38   :  { %429 = vmatmul.f32.vlgmr.msra.gmra.mxu0 %v1810_v36  ;;  %514 = vmatpush.msrb.mxu2 %v1938_v61 }
  0x39   :  { %199 = vmatpush.msrb.mxu1 %v198_v21  ;;  %v564_v21 = vand.u32 4294901760, %v1955_v13  ;;  %v576_v31 = vand.u32 4294901760, %v1964_v17  ;;  %v560_v33 = vand.u32 4294901760, %v559_v25 }
  0x3a   :  { %516 = vmatpush.msrb.mxu2 %v1941_v2 }
  0x3b   :  { %205 = vmatpush.msrb.mxu1 %v204_v27  ;;  %v1978_v27 = vsub.f32 %v482_v9, %v1958_v15  ;;  %v475_v9 = vld [vmem:[#allocation5 + $0x10] sm:$0xff] }
  0x3c   :  { %518 = vmatpush.msrb.mxu2 %v1943_v5  ;;  %v2077_v11 = vand.u32 4294901760, %v475_v9 }
  0x3d   :  { %211 = vmatpush.msrb.mxu1 %v210_v28  ;;  %v565_v28 = vsub.f32 %v1955_v13, %v564_v21 }
  0x3e   :  { %520 = vmatpush.msrb.mxu2 %v1945_v8 }
  0x3f   :  { %217 = vmatpush.msrb.mxu1 %v216_v32  ;;  %v566_v42 = vand.u32 4294901760, %v565_v28 }
  0x40   :  { %522 = vmatpush.msrb.mxu2 %v1958_v15 }
  0x41   :  { %223 = vmatpush.msrb.mxu1 %v222_v34 }
  0x42   :  { %524 = vmatpush.msrb.mxu2 %v1974_v23 }
  0x43   :  { %229 = vmatpush.msrb.mxu1 %v228_v37  ;;  %v571_v37 = vsub.f32 %v1961_v16, %v570_v24 }
  0x45   :  { %235 = vmatpush.msrb.mxu1 %v234_v39  ;;  %v588_v39 = vand.u32 4294901760, %v1978_v27 }
  0x47   :  { %241 = vmatpush.msrb.mxu1 %v240_v43  ;;  %v2009_v43 = vand.u32 4294901760, %v480_v29 }
  0x49   :  { %247 = vmatpush.msrb.mxu1 %v246_v47  ;;  %526 = vmatpush.msrb.mxu2 %v2009_v43 }
  0x4b   :  { %253 = vmatpush.msrb.mxu1 %v252_v51  ;;  %v2021_v51 = vsub.f32 %v480_v29, %v2009_v43  ;;  %v2091_v29 = vsub.f32 %v475_v9, %v2077_v11 }
  0x4d   :  { %259 = vmatpush.msrb.mxu1 %v258_v55 }
  0x4f   :  { %265 = vmatpush.msrb.mxu1 %v264_v48  ;;  %v600_v48 = vand.u32 4294901760, %v2021_v51 }
  0x50   :  { %267 = vmatmul.f32.vlgmr.msrb.gmra.mxu1 %v1810_v36 }
  0x51   :  { %434 = vmatpush.msra.mxu1 %v1725_v3  ;;  %v1949_v3 = vsub.f32 %v488_v53, %v1934_v58 }
  0x53   :  { %436 = vmatpush.msra.mxu1 %v1727_v4  ;;  %v1967_v4 = vsub.f32 %v483_v1, %v1945_v8  ;;  %v552_v19 = vand.u32 4294901760, %v1949_v3  ;;  %653 = vmatpush.msrb.mxu0 %v1949_v3 }
  0x55   :  { %438 = vmatpush.msra.mxu1 %v1730_v6  ;;  %v553_v6 = vsub.f32 %v1949_v3, %v552_v19  ;;  %v582_v32 = vand.u32 4294901760, %v1967_v4  ;;  %656 = vmatpush.msrb.mxu0 %v1952_v12  ;;  %v504_v12 = vld [vmem:[#allocation5 + $0xf8] sm:$0xff] }
  0x57   :  { %440 = vmatpush.msra.mxu1 %v1740_v10  ;;  %v479_v10 = vld [vmem:[#allocation5 + $0x30] sm:$0xff]  ;;  %v554_v34 = vand.u32 4294901760, %v553_v6  ;;  %659 = vmatpush.msrb.mxu0 %v1955_v13  ;;  %v583_v47 = vsub.f32 %v1967_v4, %v582_v32  ;;  %v502_v13 = vld [vmem:[#allocation5 + $0xe8] sm:$0xff] }
  0x58   :  { %v2011_v46 = vand.u32 4294901760, %v479_v10 }
  0x59   :  { %442 = vmatpush.msra.mxu1 %v1749_v14  ;;  %555 = vmatpush.msrb.mxu3 %v554_v34  ;;  %v577_v14 = vsub.f32 %v1964_v17, %v576_v31  ;;  %v584_v53 = vand.u32 4294901760, %v583_v47 }
  0x5a   :  { %662 = vmatpush.msrb.mxu0 %v1961_v16  ;;  %v2024_v52 = vsub.f32 %v479_v10, %v2011_v46  ;;  %528 = vmatpush.msrb.mxu2 %v2011_v46 }
  0x5b   :  { %444 = vmatpush.msra.mxu1 %v1760_v18  ;;  %561 = vmatpush.msrb.mxu3 %v560_v33  ;;  %v572_v18 = vand.u32 4294901760, %v571_v37  ;;  %v578_v55 = vand.u32 4294901760, %v577_v14  ;;  %v630_v37 = vand.u32 4294901760, %v2091_v29 }
  0x5c   :  { %665 = vmatpush.msrb.mxu0 %v1964_v17  ;;  %v606_v56 = vand.u32 4294901760, %v2024_v52 }
  0x5d   :  { %446 = vmatpush.msra.mxu1 %v1771_v22  ;;  %567 = vmatpush.msrb.mxu3 %v566_v42  ;;  %v589_v22 = vsub.f32 %v1978_v27, %v588_v39 }
  0x5e   :  { %668 = vmatpush.msrb.mxu0 %v1967_v4  ;;  %v607_v0 = vsub.f32 %v2024_v52, %v606_v56  ;;  %v501_v4 = vld [vmem:[#allocation5 + $0xe0] sm:$0xff] }
  0x5f   :  { %448 = vmatpush.msra.mxu1 %v1782_v26  ;;  %573 = vmatpush.msrb.mxu3 %v572_v18  ;;  %v595_v26 = vsub.f32 %v2001_v38, %v594_v44  ;;  %v590_v57 = vand.u32 4294901760, %v589_v22  ;;  %v631_v22 = vsub.f32 %v2091_v29, %v630_v37 }
  0x60   :  { %671 = vmatpush.msrb.mxu0 %v1978_v27 }
  0x61   :  { %450 = vmatpush.msra.mxu1 %v1793_v30  ;;  %579 = vmatpush.msrb.mxu3 %v578_v55  ;;  %v601_v30 = vsub.f32 %v2021_v51, %v600_v48  ;;  %v596_v62 = vand.u32 4294901760, %v595_v26  ;;  %v632_v26 = vand.u32 4294901760, %v631_v22  ;;  %v495_v22 = vld [vmem:[#allocation5 + $0xb0] sm:$0xff] }
  0x62   :  { %674 = vmatpush.msrb.mxu0 %v2001_v38 }
  0x63   :  { %452 = vmatpush.msra.mxu1 %v1807_v35  ;;  %585 = vmatpush.msrb.mxu3 %v584_v53  ;;  %v602_v35 = vand.u32 4294901760, %v601_v30 }
  0x64   :  { %677 = vmatpush.msrb.mxu0 %v2021_v51 }
  0x65   :  { %454 = vmatpush.msra.mxu1 %v1820_v40  ;;  %591 = vmatpush.msrb.mxu3 %v590_v57  ;;  %v608_v40 = vand.u32 4294901760, %v607_v0  ;;  %v474_v57 = vld [vmem:[#allocation5 + $0x8] sm:$0xff] }
  0x66   :  { %680 = vmatpush.msrb.mxu0 %v2024_v52  ;;  %v2119_v30 = vand.u32 4294901760, %v474_v57 }
  0x67   :  { %456 = vmatpush.msra.mxu1 %v1834_v45  ;;  %597 = vmatpush.msrb.mxu3 %v596_v62  ;;  %v478_v45 = vld [vmem:[#allocation5 + $0x28] sm:$0xff]  ;;  %v473_v62 = vld [vmem:[#allocation5] sm:$0xff] }
  0x68   :  { %v2122_v0 = vsub.f32 %v474_v57, %v2119_v30  ;;  %v2270_v57 = vand.u32 4294901760, %v495_v22 }
  0x69   :  { %458 = vmatpush.msra.mxu1 %v1845_v49  ;;  %603 = vmatpush.msrb.mxu3 %v602_v35  ;;  %v477_v49 = vld [vmem:[#allocation5 + $0x20] sm:$0xff]  ;;  %v2124_v35 = vand.u32 4294901760, %v473_v62 }
  0x6b   :  { %460 = vmatpush.msra.mxu1 %v1859_v54  ;;  %609 = vmatpush.msrb.mxu3 %v608_v40  ;;  %v476_v54 = vld [vmem:[#allocation5 + $0x18] sm:$0xff]  ;;  %v636_v40 = vand.u32 4294901760, %v2122_v0 }
  0x6c   :  { %v2075_v1 = vand.u32 4294901760, %v476_v54 }
  0x6d   :  { %462 = vmatpush.msra.mxu1 %v1873_v59  ;;  %v2071_v59 = vand.u32 4294901760, %v478_v45 }
  0x6e   :  { %v2086_v28 = vsub.f32 %v476_v54, %v2075_v1 }
  0x6f   :  { %464 = vmatpush.msra.mxu1 %v1886_v63  ;;  %v2073_v63 = vand.u32 4294901760, %v477_v49  ;;  %v2080_v6 = vsub.f32 %v478_v45, %v2071_v59  ;;  %530 = vmatpush.msrb.mxu2 %v2071_v59  ;;  %v2130_v45 = vsub.f32 %v473_v62, %v2124_v35 }
  0x70   :  { %466 = vmatmul.f32.vlgmr.msra.gmra.mxu1 %v1810_v36  ;;  %v624_v33 = vand.u32 4294901760, %v2086_v28 }
  0x71   :  { %706 = vmatpush.msrb.mxu1 %v1934_v58  ;;  %v2083_v25 = vsub.f32 %v477_v49, %v2073_v63  ;;  %v612_v10 = vand.u32 4294901760, %v2080_v6  ;;  %532 = vmatpush.msrb.mxu2 %v2073_v63  ;;  %v637_v49 = vsub.f32 %v2122_v0, %v636_v40  ;;  %v642_v54 = vand.u32 4294901760, %v2130_v45 }
  0x72   :  { %683 = vmatpush.msrb.mxu0 %v2080_v6  ;;  %v625_v47 = vsub.f32 %v2086_v28, %v624_v33 }
  0x73   :  { %708 = vmatpush.msrb.mxu1 %v1936_v60  ;;  %v618_v34 = vand.u32 4294901760, %v2083_v25  ;;  %v613_v42 = vsub.f32 %v2080_v6, %v612_v10  ;;  %534 = vmatpush.msrb.mxu2 %v2075_v1  ;;  %v638_v9 = vand.u32 4294901760, %v637_v49 }
  0x74   :  { %686 = vmatpush.msrb.mxu0 %v2083_v25  ;;  %v626_v53 = vand.u32 4294901760, %v625_v47 }
  0x75   :  { %710 = vmatpush.msrb.mxu1 %v1938_v61  ;;  %v619_v14 = vsub.f32 %v2083_v25, %v618_v34  ;;  %v614_v18 = vand.u32 4294901760, %v613_v42  ;;  %536 = vmatpush.msrb.mxu2 %v2077_v11  ;;  %v643_v42 = vsub.f32 %v2130_v45, %v642_v54 }
  0x76   :  { %689 = vmatpush.msrb.mxu0 %v2086_v28 }
  0x77   :  { %712 = vmatpush.msrb.mxu1 %v1941_v2  ;;  %v620_v55 = vand.u32 4294901760, %v619_v14  ;;  %615 = vmatpush.msrb.mxu3 %v614_v18  ;;  %v644_v3 = vand.u32 4294901760, %v643_v42  ;;  %v496_v14 = vld [vmem:[#allocation5 + $0xb8] sm:$0xff] }
  0x78   :  { %692 = vmatpush.msrb.mxu0 %v2091_v29  ;;  %538 = vmatpush.msrb.mxu2 %v2119_v30  ;;  %v2259_v18 = vand.u32 4294901760, %v496_v14 }
  0x79   :  { %714 = vmatpush.msrb.mxu1 %v1943_v5  ;;  %621 = vmatpush.msrb.mxu3 %v620_v55 }
  0x7a   :  { %540 = vmatpush.msrb.mxu2 %v2124_v35  ;;  %695 = vmatpush.msrb.mxu0 %v2122_v0  ;;  %v2274_v62 = vsub.f32 %v496_v14, %v2259_v18 }
  0x7b   :  { %716 = vmatpush.msrb.mxu1 %v1945_v8  ;;  %627 = vmatpush.msrb.mxu3 %v626_v53 }
  0x7c   :  { %747 = vmatpush.msra.mxu2 %v552_v19  ;;  %698 = vmatpush.msrb.mxu0 %v2130_v45  ;;  %v503_v19 = vld [vmem:[#allocation5 + $0xf0] sm:$0xff] }
  0x7d   :  { %718 = vmatpush.msrb.mxu1 %v1958_v15  ;;  %633 = vmatpush.msrb.mxu3 %v632_v26  ;;  %v2162_v16 = vand.u32 4294901760, %v503_v19 }
  0x7e   :  { %751 = vmatpush.msra.mxu2 %v558_v20  ;;  %v2158_v20 = vand.u32 4294901760, %v504_v12 }
  0x7f   :  { %720 = vmatpush.msrb.mxu1 %v1974_v23  ;;  %639 = vmatpush.msrb.mxu3 %v638_v9  ;;  %v2172_v17 = vsub.f32 %v503_v19, %v2162_v16  ;;  %v2284_v9 = vsub.f32 %v495_v22, %v2270_v57 }
  0x80   :  { %755 = vmatpush.msra.mxu2 %v564_v21  ;;  %851 = vmatpush.msra.mxu0 %v2158_v20 }
  0x81   :  { %722 = vmatpush.msrb.mxu1 %v2009_v43  ;;  %645 = vmatpush.msrb.mxu3 %v644_v3  ;;  %v899_v21 = vand.u32 4294901760, %v2172_v17 }
  0x82   :  { %759 = vmatpush.msra.mxu2 %v570_v24  ;;  %853 = vmatpush.msra.mxu0 %v2162_v16 }
  0x83   :  { %724 = vmatpush.msrb.mxu1 %v2011_v46  ;;  %814 = vmatpush.msra.mxu3 %v1934_v58  ;;  %v2164_v58 = vand.u32 4294901760, %v502_v13 }
  0x84   :  { %763 = vmatpush.msra.mxu2 %v576_v31  ;;  %v2194_v31 = vand.u32 4294901760, %v501_v4 }
  0x85   :  { %726 = vmatpush.msrb.mxu1 %v2071_v59  ;;  %816 = vmatpush.msra.mxu3 %v1936_v60  ;;  %v2169_v60 = vsub.f32 %v504_v12, %v2158_v20 }
  0x86   :  { %767 = vmatpush.msra.mxu2 %v582_v32  ;;  %855 = vmatpush.msra.mxu0 %v2164_v58  ;;  %v2215_v51 = vsub.f32 %v501_v4, %v2194_v31  ;;  %v492_v4 = vld [vmem:[#allocation5 + $0x98] sm:$0xff] }
  0x87   :  { %728 = vmatpush.msrb.mxu1 %v2073_v63  ;;  %818 = vmatpush.msra.mxu3 %v1938_v61  ;;  %v2175_v61 = vsub.f32 %v502_v13, %v2164_v58  ;;  %v947_v13 = vand.u32 4294901760, %v2284_v9 }
  0x88   :  { %771 = vmatpush.msra.mxu2 %v588_v39  ;;  %857 = vmatpush.msra.mxu0 %v2194_v31 }
  0x89   :  { %730 = vmatpush.msrb.mxu1 %v2075_v1  ;;  %820 = vmatpush.msra.mxu3 %v1941_v2  ;;  %v893_v2 = vand.u32 4294901760, %v2169_v60  ;;  %v905_v24 = vand.u32 4294901760, %v2175_v61 }
  0x8a   :  { %775 = vmatpush.msra.mxu2 %v594_v44  ;;  %v500_v44 = vld [vmem:[#allocation5 + $0xd8] sm:$0xff] }
  0x8b   :  { %732 = vmatpush.msrb.mxu1 %v2077_v11  ;;  %822 = vmatpush.msra.mxu3 %v1943_v5  ;;  %v894_v27 = vsub.f32 %v2169_v60, %v893_v2  ;;  %v900_v5 = vsub.f32 %v2172_v17, %v899_v21  ;;  %v906_v32 = vsub.f32 %v2175_v61, %v905_v24 }
  0x8c   :  { %779 = vmatpush.msra.mxu2 %v600_v48  ;;  %v498_v48 = vld [vmem:[#allocation5 + $0xc8] sm:$0xff] }
  0x8d   :  { %734 = vmatpush.msrb.mxu1 %v2119_v30  ;;  %824 = vmatpush.msra.mxu3 %v1945_v8  ;;  %v895_v8 = vand.u32 4294901760, %v894_v27  ;;  %v901_v38 = vand.u32 4294901760, %v900_v5  ;;  %v907_v39 = vand.u32 4294901760, %v906_v32  ;;  %v2235_v6 = vand.u32 4294901760, %v498_v48 }
  0x8e   :  { %783 = vmatpush.msra.mxu2 %v606_v56  ;;  %v2298_v5 = vand.u32 4294901760, %v492_v4 }
  0x8f   :  { %736 = vmatpush.msrb.mxu1 %v2124_v35  ;;  %826 = vmatpush.msra.mxu3 %v1958_v15  ;;  %v2212_v15 = vand.u32 4294901760, %v500_v44 }
  0x90   :  { %787 = vmatpush.msra.mxu2 %v612_v10  ;;  %v497_v10 = vld [vmem:[#allocation5 + $0xc0] sm:$0xff] }
  0x91   :  { %828 = vmatpush.msra.mxu3 %v1974_v23  ;;  %896 = vmatpush.msra.mxu1 %v895_v8  ;;  %v499_v23 = vld [vmem:[#allocation5 + $0xd0] sm:$0xff]  ;;  %v1589_v8 = vld [vmem:[%s2460_s2] ss:$0 sm:$0xff] }
  0x92   :  { %791 = vmatpush.msra.mxu2 %v618_v34  ;;  %859 = vmatpush.msra.mxu0 %v2212_v15  ;;  %v2222_v52 = vand.u32 4294901760, %v499_v23  ;;  %v2248_v34 = vand.u32 4294901760, %v497_v10 }
  0x93   :  { %830 = vmatpush.msra.mxu3 %v2009_v43  ;;  %902 = vmatpush.msra.mxu1 %v901_v38  ;;  %v911_v43 = vand.u32 4294901760, %v2215_v51 }
  0x94   :  { %795 = vmatpush.msra.mxu2 %v624_v33  ;;  %861 = vmatpush.msra.mxu0 %v2222_v52  ;;  %v2238_v25 = vsub.f32 %v499_v23, %v2222_v52  ;;  %v2251_v33 = vsub.f32 %v498_v48, %v2235_v6  ;;  %v2262_v55 = vsub.f32 %v497_v10, %v2248_v34  ;;  %v490_v10 = vld [vmem:[#allocation5 + $0x88] sm:$0xff] }
  0x95   :  { %832 = vmatpush.msra.mxu3 %v2011_v46  ;;  %908 = vmatpush.msra.mxu1 %v907_v39  ;;  %v2225_v46 = vsub.f32 %v500_v44, %v2212_v15  ;;  %v912_v56 = vsub.f32 %v2215_v51, %v911_v43  ;;  %v948_v39 = vsub.f32 %v2284_v9, %v947_v13  ;;  %v491_v44 = vld [vmem:[#allocation5 + $0x90] sm:$0xff] }
  0x96   :  { %799 = vmatpush.msra.mxu2 %v630_v37  ;;  %863 = vmatpush.msra.mxu0 %v2235_v6  ;;  %v923_v29 = vand.u32 4294901760, %v2238_v25  ;;  %v929_v47 = vand.u32 4294901760, %v2251_v33  ;;  %v935_v26 = vand.u32 4294901760, %v2262_v55 }
  0x97   :  { %834 = vmatpush.msra.mxu3 %v2071_v59  ;;  %v917_v59 = vand.u32 4294901760, %v2225_v46  ;;  %v913_v28 = vand.u32 4294901760, %v912_v56  ;;  %v2314_v56 = vand.u32 4294901760, %v491_v44 }
  0x98   :  { %803 = vmatpush.msra.mxu2 %v636_v40  ;;  %865 = vmatpush.msra.mxu0 %v2248_v34  ;;  %v930_v53 = vsub.f32 %v2251_v33, %v929_v47  ;;  %v936_v40 = vsub.f32 %v2262_v55, %v935_v26 }
  0x99   :  { %836 = vmatpush.msra.mxu3 %v2073_v63  ;;  %v918_v63 = vsub.f32 %v2225_v46, %v917_v59  ;;  %914 = vmatpush.msra.mxu1 %v913_v28  ;;  %v2317_v28 = vsub.f32 %v492_v4, %v2298_v5 }
  0x9a   :  { %807 = vmatpush.msra.mxu2 %v642_v54  ;;  %867 = vmatpush.msra.mxu0 %v2259_v18  ;;  %v931_v0 = vand.u32 4294901760, %v930_v53  ;;  %v941_v54 = vand.u32 4294901760, %v2274_v62  ;;  %v937_v42 = vand.u32 4294901760, %v936_v40  ;;  %v2327_v53 = vsub.f32 %v491_v44, %v2314_v56 }
  0x9b   :  { %838 = vmatpush.msra.mxu3 %v2075_v1  ;;  %v919_v37 = vand.u32 4294901760, %v918_v63  ;;  %v924_v1 = vsub.f32 %v2238_v25, %v923_v29  ;;  %v949_v63 = vand.u32 4294901760, %v948_v39  ;;  %v2466_v14 = vand.u32 4294901760, %v2317_v28 }
  0x9c   :  { %869 = vmatpush.msra.mxu0 %v2270_v57  ;;  %v942_v19 = vsub.f32 %v2274_v62, %v941_v54 }
  0x9d   :  { %840 = vmatpush.msra.mxu3 %v2077_v11  ;;  %920 = vmatpush.msra.mxu1 %v919_v37  ;;  %v925_v11 = vand.u32 4294901760, %v924_v1  ;;  %v966_v40 = vsub.f32 %v2317_v28, %v2466_v14 }
  0x9e   :  { %v943_v38 = vand.u32 4294901760, %v942_v19 }
  0x9f   :  { %842 = vmatpush.msra.mxu3 %v2119_v30  ;;  %926 = vmatpush.msra.mxu1 %v925_v11  ;;  %v494_v30 = vld [vmem:[#allocation5 + $0xa8] sm:$0xff]  ;;  %v2324_v11 = vand.u32 4294901760, %v490_v10  ;;  %v967_v4 = vand.u32 4294901760, %v966_v40 }
  0xa0   :  { %v2280_v45 = vand.u32 4294901760, %v494_v30 }
  0xa1   :  { %844 = vmatpush.msra.mxu3 %v2124_v35  ;;  %v493_v35 = vld [vmem:[#allocation5 + $0xa0] sm:$0xff]  ;;  %932 = vmatpush.msra.mxu1 %v931_v0 }
  0xa2   :  { %871 = vmatpush.msra.mxu0 %v2280_v45  ;;  %v2287_v3 = vand.u32 4294901760, %v493_v35  ;;  %v2290_v12 = vsub.f32 %v494_v30, %v2280_v45  ;;  %v489_v30 = vld [vmem:[#allocation5 + $0x80] sm:$0xff] }
  0xa3   :  { %938 = vmatpush.msra.mxu1 %v937_v42  ;;  %v2336_v42 = vsub.f32 %v490_v10, %v2324_v11 }
  0xa4   :  { %873 = vmatpush.msra.mxu0 %v2287_v3  ;;  %v953_v27 = vand.u32 4294901760, %v2290_v12  ;;  %v2301_v32 = vsub.f32 %v493_v35, %v2287_v3  ;;  %v2333_v35 = vand.u32 4294901760, %v489_v30 }
  0xa5   :  { %944 = vmatpush.msra.mxu1 %v943_v38 }
  0xa6   :  { %v954_v23 = vsub.f32 %v2290_v12, %v953_v27  ;;  %875 = vmatpush.msra.mxu0 %v2298_v5  ;;  %v2469_v48 = vand.u32 4294901760, %v2301_v32  ;;  %v2342_v38 = vsub.f32 %v489_v30, %v2333_v35 }
  0xa7   :  { %950 = vmatpush.msra.mxu1 %v949_v63 }
  0xa8   :  { %v955_v37 = vand.u32 4294901760, %v954_v23  ;;  %v960_v1 = vsub.f32 %v2301_v32, %v2469_v48  ;;  %877 = vmatpush.msra.mxu0 %v2314_v56  ;;  %v983_v63 = vand.u32 4294901760, %v2342_v38 }
  0xaa   :  { %v961_v0 = vand.u32 4294901760, %v960_v1  ;;  %879 = vmatpush.msra.mxu0 %v2324_v11  ;;  %956 = vmatpush.msra.mxu1 %v955_v37  ;;  %v984_v30 = vsub.f32 %v2342_v38, %v983_v63 }
  0xac   :  { %881 = vmatpush.msra.mxu0 %v2333_v35  ;;  %962 = vmatpush.msra.mxu1 %v961_v0  ;;  %v985_v40 = vand.u32 4294901760, %v984_v30 }
  0xad   :  { %v167_v49 = vpop.f32.mrf.mxu1 }
  0xae   :  { %v168_v22 = vadd.f32 %v1589_v8, %v167_v49  ;;  %v2467_v49 = vand.u32 4294901760, %v2327_v53  ;;  %v2468_v8 = vand.u32 4294901760, %v2336_v42  ;;  %968 = vmatpush.msra.mxu1 %v967_v4 }
  0xb0   :  { %v972_v39 = vsub.f32 %v2327_v53, %v2467_v49  ;;  %v978_v23 = vsub.f32 %v2336_v42, %v2468_v8 }
  0xb2   :  { %v973_v37 = vand.u32 4294901760, %v972_v39  ;;  %v979_v1 = vand.u32 4294901760, %v978_v23 }
  0xb4   :  { %974 = vmatpush.msra.mxu1 %v973_v37 }
  0xb5   :  { %v322_v10 = vpop.f32.mrf.mxu2  ;;  %v361_v14 = vpop.f32.mrf.mxu3 }
  0xb6   :  { %980 = vmatpush.msra.mxu1 %v979_v1 }
  0xb8   :  { %986 = vmatpush.msra.mxu1 %v985_v40 }
  0xcd   :  { %v268_v19 = vpop.f32.mrf.mxu1 }
  0xce   :  { %v269_v44 = vadd.f32 %v268_v19, %v168_v22  ;;  %v430_v19 = vpop.f32.mrf.mxu0 }
  0xd0   :  { %v323_v0 = vadd.f32 %v322_v10, %v269_v44 }
  0xd2   :  { %v362_v22 = vadd.f32 %v361_v14, %v323_v0 }
  0xd4   :  { %v431_v49 = vadd.f32 %v430_v19, %v362_v22 }
  0xed   :  { %v467_v8 = vpop.f32.mrf.mxu1 }
  0xee   :  { %v2354_v48 = vadd.f32 %v467_v8, %v431_v49 }
  0xf0   :  { %v541_v4 = vand.u32 4294901760, %v2354_v48 }
  0xf2   :  { %647 = vmatmul.f32.vlgmr.msrb.gmra.mxu3 %v541_v4  ;;  %v542_v39 = vsub.f32 %v2354_v48, %v541_v4 }
  0xf3   :  { %1047 = vmatpush.msrb.mxu3 %v2158_v20 }
  0xf4   :  { %701 = vmatmul.f32.vlgmr.msrb.gmra.mxu0 %v542_v39  ;;  %v543_v23 = vand.u32 4294901760, %v542_v39 }
  0xf5   :  { %1049 = vmatpush.msrb.mxu3 %v2162_v16  ;;  %1088 = vmatpush.msrb.mxu0 %v893_v2  ;;  %v1569_v2 = vld [vmem:[#allocation7 + $0x58] sm:$0xff] }
  0xf6   :  { %740 = vmatmul.f32.vlgmr.msrb.gmra.mxu1 %v543_v23  ;;  %v544_v14 = vsub.f32 %v542_v39, %v543_v23  ;;  %v1591_v23 = vld [vmem:[%s2464_s6] ss:$0 sm:$0xff] }
  0xf7   :  { %1051 = vmatpush.msrb.mxu3 %v2164_v58  ;;  %1092 = vmatpush.msrb.mxu0 %v899_v21  ;;  %v1568_v21 = vld [vmem:[#allocation7 + $0x50] sm:$0xff] }
  0xf8   :  { %v545_v49 = vand.u32 4294901760, %v544_v14  ;;  %1155 = vmatpush.msrb.mxu1 %v2158_v20  ;;  %v2470_v20 = vand.u32 4294901760, %v2301_v32 }
  0xf9   :  { %1053 = vmatpush.msrb.mxu3 %v2194_v31  ;;  %1096 = vmatpush.msrb.mxu0 %v905_v24  ;;  %v1567_v24 = vld [vmem:[#allocation7 + $0x48] sm:$0xff] }
  0xfa   :  { %546 = vmatmul.f32.vlgmr.msrb.gmra.mxu2 %v545_v49  ;;  %846 = vmatmul.f32.vlgmr.msra.gmra.mxu3 %v541_v4 }
  0xfb   :  { %994 = vmatpush.msrb.mxu2 %v2169_v60  ;;  %1055 = vmatpush.msrb.mxu3 %v2212_v15  ;;  %v2472_v60 = vand.u32 4294901760, %v2327_v53 }
  0xfc   :  { %1157 = vmatpush.msrb.mxu1 %v2162_v16  ;;  %1100 = vmatpush.msrb.mxu0 %v911_v43  ;;  %v1572_v16 = vld [vmem:[#allocation7 + $0x70] sm:$0xff] }
  0xfd   :  { %997 = vmatpush.msrb.mxu2 %v2172_v17  ;;  %1057 = vmatpush.msrb.mxu3 %v2222_v52  ;;  %v1571_v17 = vld [vmem:[#allocation7 + $0x68] sm:$0xff]  ;;  %v1580_v43 = vld [vmem:[#allocation7 + $0xb0] sm:$0xff] }
  0xfe   :  { %1159 = vmatpush.msrb.mxu1 %v2164_v58  ;;  %887 = vmatmul.f32.vlgmr.msra.gmra.mxu0 %v1896_v7  ;;  %v1573_v7 = vld [vmem:[#allocation7 + $0x78] sm:$0xff]  ;;  %v2471_v58 = vand.u32 4294901760, %v2317_v28 }
  0xff   :  { %1000 = vmatpush.msrb.mxu2 %v2175_v61  ;;  %1059 = vmatpush.msrb.mxu3 %v2235_v6  ;;  %v2473_v61 = vand.u32 4294901760, %v2336_v42 }
 0x100   :  { %1104 = vmatpush.msrb.mxu0 %v917_v59  ;;  %1161 = vmatpush.msrb.mxu1 %v2194_v31  ;;  %v1566_v31 = vld [vmem:[#allocation7 + $0x40] sm:$0xff] }
 0x101   :  { %1003 = vmatpush.msrb.mxu2 %v2215_v51  ;;  %1061 = vmatpush.msrb.mxu3 %v2248_v34  ;;  %v1565_v51 = vld [vmem:[#allocation7 + $0x38] sm:$0xff]  ;;  %v1578_v59 = vld [vmem:[#allocation7 + $0xa0] sm:$0xff] }
 0x102   :  { %809 = vmatmul.f32.vlgmr.msra.gmra.mxu2 %v541_v4  ;;  %988 = vmatmul.f32.vlgmr.msra.gmra.mxu1 %v1810_v36 }
 0x103   :  { %1006 = vmatpush.msrb.mxu2 %v2225_v46  ;;  %1063 = vmatpush.msrb.mxu3 %v2259_v18  ;;  %v1579_v46 = vld [vmem:[#allocation7 + $0xa8] sm:$0xff] }
 0x104   :  { %1108 = vmatpush.msrb.mxu0 %v923_v29  ;;  %1163 = vmatpush.msrb.mxu1 %v2212_v15  ;;  %v1581_v15 = vld [vmem:[#allocation7 + $0xb8] sm:$0xff] }
 0x105   :  { %1009 = vmatpush.msrb.mxu2 %v2238_v25  ;;  %1065 = vmatpush.msrb.mxu3 %v2270_v57  ;;  %v1577_v25 = vld [vmem:[#allocation7 + $0x98] sm:$0xff] }
 0x106   :  { %1112 = vmatpush.msrb.mxu0 %v929_v47  ;;  %1165 = vmatpush.msrb.mxu1 %v2222_v52  ;;  %v1564_v52 = vld [vmem:[#allocation7 + $0x30] sm:$0xff]  ;;  %v1561_v29 = vld [vmem:[#allocation7 + $0x18] sm:$0xff]  ;;  %v1590_v47 = vld [vmem:[%s2462_s4] ss:$0 sm:$0xff] }
 0x107   :  { %1012 = vmatpush.msrb.mxu2 %v2251_v33  ;;  %1067 = vmatpush.msrb.mxu3 %v2280_v45  ;;  %v1560_v33 = vld [vmem:[#allocation7 + $0x10] sm:$0xff] }
 0x108   :  { %1116 = vmatpush.msrb.mxu0 %v935_v26  ;;  %1167 = vmatpush.msrb.mxu1 %v2235_v6  ;;  %v1562_v6 = vld [vmem:[#allocation7 + $0x20] sm:$0xff]  ;;  %v1559_v26 = vld [vmem:[#allocation7 + $0x8] sm:$0xff] }
 0x109   :  { %1015 = vmatpush.msrb.mxu2 %v2262_v55  ;;  %1069 = vmatpush.msrb.mxu3 %v2287_v3  ;;  %v1575_v55 = vld [vmem:[#allocation7 + $0x88] sm:$0xff] }
 0x10a   :  { %1120 = vmatpush.msrb.mxu0 %v941_v54  ;;  %1169 = vmatpush.msrb.mxu1 %v2248_v34  ;;  %v1576_v34 = vld [vmem:[#allocation7 + $0x90] sm:$0xff]  ;;  %v1558_v54 = vld [vmem:[#allocation7] sm:$0xff] }
 0x10b   :  { %1018 = vmatpush.msrb.mxu2 %v2274_v62  ;;  %1071 = vmatpush.msrb.mxu3 %v2298_v5  ;;  %v1574_v62 = vld [vmem:[#allocation7 + $0x80] sm:$0xff] }
 0x10c   :  { %1124 = vmatpush.msrb.mxu0 %v947_v13  ;;  %1171 = vmatpush.msrb.mxu1 %v2259_v18 }
 0x10d   :  { %1021 = vmatpush.msrb.mxu2 %v2284_v9  ;;  %1073 = vmatpush.msrb.mxu3 %v2314_v56 }
 0x10e   :  { %1128 = vmatpush.msrb.mxu0 %v953_v27  ;;  %1173 = vmatpush.msrb.mxu1 %v2270_v57 }
 0x10f   :  { %1024 = vmatpush.msrb.mxu2 %v2290_v12  ;;  %1075 = vmatpush.msrb.mxu3 %v2324_v11 }
 0x110   :  { %1132 = vmatpush.msrb.mxu0 %v2470_v20  ;;  %1175 = vmatpush.msrb.mxu1 %v2280_v45 }
 0x111   :  { %1027 = vmatpush.msrb.mxu2 %v2301_v32  ;;  %1077 = vmatpush.msrb.mxu3 %v2333_v35 }
 0x112   :  { %1136 = vmatpush.msrb.mxu0 %v2471_v58  ;;  %1081 = vmatmul.f32.vlgmr.msrb.gmra.mxu3 %v1849_v50  ;;  %v1570_v50 = vld [vmem:[#allocation7 + $0x60] sm:$0xff] }
 0x113   :  { %1407 = vmatpush.bf16.msra.mxu3 %v1573_v7  ;;  %1030 = vmatpush.msrb.mxu2 %v2317_v28 }
 0x114   :  { %1177 = vmatpush.msrb.mxu1 %v2287_v3  ;;  %1140 = vmatpush.msrb.mxu0 %v2472_v60  ;;  %v1592_v3 = vld [vmem:[%s2458_s0] sm:$0xff] }
 0x115   :  { %1033 = vmatpush.msrb.mxu2 %v2327_v53  ;;  %v1197_v12 = vpack.c.bf16 %v1592_v3, %v1592_v3 }
 0x116   :  { %1179 = vmatpush.msrb.mxu1 %v2298_v5  ;;  %1144 = vmatpush.msrb.mxu0 %v2473_v61 }
 0x117   :  { %1408 = vmatpush.bf16.msra.mxu3 %v1572_v16  ;;  %1036 = vmatpush.msrb.mxu2 %v2336_v42 }
 0x118   :  { %1181 = vmatpush.msrb.mxu1 %v2314_v56  ;;  %1148 = vmatpush.msrb.mxu0 %v983_v63 }
 0x119   :  { %1039 = vmatpush.msrb.mxu2 %v2342_v38  ;;  %1150 = vmatmul.f32.vlgmr.msrb.gmra.mxu0 %v1810_v36 }
 0x11a   :  { %1042 = vmatmul.f32.vlgmr.msrb.gmra.mxu2 %v1824_v41  ;;  %1183 = vmatpush.msrb.mxu1 %v2324_v11  ;;  %v1196_v41 = vpack.c.bf16 %v2354_v48, %v2354_v48 }
 0x11b   :  { %1409 = vmatpush.bf16.msra.mxu3 %v1571_v17  ;;  %1420 = vmatpush.bf16.msra.mxu0 %v1581_v15 }
 0x11c   :  { %1185 = vmatpush.msrb.mxu1 %v2333_v35  ;;  %1394 = vmatpush.bf16.msra.mxu2 %v1565_v51 }
 0x11d   :  { %1187 = vmatmul.f32.vlgmr.msrb.gmra.mxu1 %v1810_v36  ;;  %v1563_v36 = vld [vmem:[#allocation7 + $0x28] sm:$0xff] }
 0x11f   :  { %1410 = vmatpush.bf16.msra.mxu3 %v1570_v50  ;;  %1421 = vmatpush.bf16.msra.mxu0 %v1580_v43 }
 0x120   :  { %1395 = vmatpush.bf16.msra.mxu2 %v1564_v52 }
 0x123   :  { %1411 = vmatpush.bf16.msra.mxu3 %v1569_v2  ;;  %1422 = vmatpush.bf16.msra.mxu0 %v1579_v46 }
 0x124   :  { %1396 = vmatpush.bf16.msra.mxu2 %v1563_v36 }
 0x127   :  { %1412 = vmatpush.bf16.msra.mxu3 %v1568_v21  ;;  %1423 = vmatpush.bf16.msra.mxu0 %v1578_v59 }
 0x128   :  { %1397 = vmatpush.bf16.msra.mxu2 %v1562_v6 }
 0x12b   :  { %1413 = vmatpush.bf16.msra.mxu3 %v1567_v24  ;;  %1424 = vmatpush.bf16.msra.mxu0 %v1577_v25 }
 0x12c   :  { %1398 = vmatpush.bf16.msra.mxu2 %v1561_v29 }
 0x12f   :  { %1414 = vmatpush.bf16.msra.mxu3 %v1566_v31  ;;  %1425 = vmatpush.bf16.msra.mxu0 %v1576_v34 }
 0x130   :  { %1399 = vmatpush.bf16.msra.mxu2 %v1560_v33 }
 0x132   :  { %1415 = vmatmul.bf16.vlgmr.msra.gmra.mxu3 %v1196_v41 }
 0x133   :  { %1426 = vmatpush.bf16.msra.mxu0 %v1575_v55 }
 0x134   :  { %1400 = vmatpush.bf16.msra.mxu2 %v1559_v26 }
 0x137   :  { %1427 = vmatpush.bf16.msra.mxu0 %v1574_v62 }
 0x138   :  { %1401 = vmatpush.bf16.msra.mxu2 %v1558_v54 }
 0x13a   :  { %1428 = vmatmul.bf16.vlgmr.msra.gmra.mxu0 %v1197_v12 }
 0x171   :  { %v702_v13 = vpop.f32.mrf.mxu0 }
 0x173   :  { %v741_v5 = vpop.f32.mrf.mxu1 }
 0x175   :  { %v648_v45 = vpop.f32.mrf.mxu3 }
 0x17b   :  { %v888_v53 = vpop.f32.mrf.mxu0 }
 0x17d   :  { %v547_v18 = vpop.f32.mrf.mxu2  ;;  %v847_v28 = vpop.f32.mrf.mxu3 }
 0x17e   :  { %v548_v57 = vadd.f32 %v1590_v47, %v547_v18 }
 0x17f   :  { %v989_v42 = vpop.f32.mrf.mxu1 }
 0x180   :  { %v649_v9 = vadd.f32 %v648_v45, %v548_v57 }
 0x182   :  { %v703_v27 = vadd.f32 %v702_v13, %v649_v9 }
 0x184   :  { %v742_v32 = vadd.f32 %v741_v5, %v703_v27 }
 0x185   :  { %v810_v48 = vpop.f32.mrf.mxu2 }
 0x186   :  { %v811_v56 = vadd.f32 %v810_v48, %v742_v32 }
 0x188   :  { %v848_v11 = vadd.f32 %v847_v28, %v811_v56 }
 0x18a   :  { %v889_v35 = vadd.f32 %v888_v53, %v848_v11 }
 0x18c   :  { %v990_v8 = vadd.f32 %v989_v42, %v889_v35 }
 0x195   :  { %v1082_v44 = vpop.f32.mrf.mxu3 }
 0x196   :  { %v1151_v10 = vpop.f32.mrf.mxu0 }
 0x19a   :  { %v1188_v1 = vpop.f32.mrf.mxu1 }
 0x19d   :  { %v1043_v38 = vpop.f32.mrf.mxu2 }
 0x19e   :  { %v1044_v63 = vadd.f32 %v1043_v38, %v990_v8 }
 0x1a0   :  { %v1083_v37 = vadd.f32 %v1082_v44, %v1044_v63 }
 0x1a2   :  { %v1152_v30 = vadd.f32 %v1151_v10, %v1083_v37 }
 0x1a4   :  { %v1189_v0 = vadd.f32 %v1188_v1, %v1152_v30 }
 0x1a6   :  { %v1195_v40 = vpack.c.bf16 %v1189_v0, %v1189_v0 }
 0x1a8   :  { %1402 = vmatmul.bf16.vlgmr.msra.gmra.mxu2 %v1195_v40 }
 0x1b5   :  { %v1416_v22 = vpop.f32.mrf.mxu3 }
 0x1b7   :  { %v1429_v4 = vpop.f32.mrf.mxu0 }
 0x1bd   :  { %v1418_v19 = vpop.f32.mrf.mxu3 }
 0x1bf   :  { %v1431_v39 = vpop.f32.mrf.mxu0 }
 0x22b   :  { %v1403_v14 = vpop.f32.mrf.mxu2 }
 0x22c   :  { %v1404_v49 = vadd.f32 %v1591_v23, %v1403_v14 }
 0x22e   :  { %v1417_v7 = vadd.f32 %v1416_v22, %v1404_v49 }
 0x230   :  { %v1430_v20 = vadd.f32 %v1429_v4, %v1417_v7 }
 0x232   :  { %1433 = vst [vmem:[%s2465_s7] sm:$0xff] %v1430_v20 }
 0x233   :  { %v1405_v16 = vpop.f32.mrf.mxu2 }
 0x234   :  { %1449 = vsyncpa [#allocation4], 1 }
 0x235   :  { %1450 = vsyncpa [#allocation6], 1 }

// kernel: _lambda_.1
= control target key start
LH: loop header
LB: loop body
LE: loop exit
PB: predicated region body
PF: predicated region fallthrough
CT: control target
= control target key end

     0   :  { %12 = vsyncpa [#allocation4], 0  ;;  %s2458_s0 = inlined_call_operand.vmem [shape: f32[8,128], index: 0, kind: input, shape index: {}]   ;;  %s2459_s1 = inlined_call_operand.hbm [shape: f32[128,128], index: 1, kind: input, shape index: {}]   ;;  %s2460_s2 = inlined_call_operand.vmem [shape: f32[1,128], index: 2, kind: input, shape index: {}]   ;;  %s2461_s3 = inlined_call_operand.hbm [shape: f32[256,128], index: 3, kind: input, shape index: {}]   ;;  %s2462_s4 = inlined_call_operand.vmem [shape: f32[1,128], index: 4, kind: input, shape index: {}]   ;;  %s2463_s5 = inlined_call_operand.hbm [shape: bf16[384,128], index: 5, kind: input, shape index: {}]   ;;  %s2464_s6 = inlined_call_operand.vmem [shape: f32[1,128], index: 6, kind: input, shape index: {}]   ;;  %s2465_s7 = inlined_call_operand.vmem [shape: f32[8,128], index: 7, kind: output, shape index: {}]  }
   0x1   :  { %13 = vsyncpa [#allocation6], 0  ;;  %s35_s26 = sshll.u32 %s2461_s3, 4  ;;  %s1669_s27 = smov [#allocation5]   ;;  %s36_s26 = int_to_ptr.hbm [resolvable:$true] %s35_s26 }
   0x2   :  { %s37_s28 = sshll.u32 %s1669_s27, 4  ;;  %s20_s8 = sshll.u32 %s2459_s1, 4  ;;  %s38_s28 = int_to_ptr.vmem [resolvable:$true] %s37_s28  ;;  %s21_s8 = int_to_ptr.hbm [resolvable:$true] %s20_s8 }
   0x3   :  { %s1670_s9 = smov 128   ;;  %s1671_s10 = smov 8  }
   0x4   :  { %43 = dma.hbm_to_vmem [thread:$0]  %s36_s26, 4096, %s38_s28, [#allocation6], %s1670_s9, %s1670_s9, %s1671_s10  }
   0x5   :  { %s1672_s11 = smov [#allocation3]   ;;  %s53_s15 = sshll.u32 %s2463_s5, 4  ;;  %s54_s15 = int_to_ptr.hbm [resolvable:$true] %s53_s15 }
   0x6   :  { %s22_s12 = sshll.u32 %s1672_s11, 4  ;;  %s1673_s3 = smov [#allocation7]   ;;  %s23_s12 = int_to_ptr.vmem [resolvable:$true] %s22_s12 }
   0x7   :  { %28 = dma.hbm_to_vmem [thread:$0]  %s21_s8, 2048, %s23_s12, [#allocation4], %s1670_s9, %s1670_s9, %s1671_s10  }
   0x8   :  { %s55_s16 = sshll.u32 %s1673_s3, 4  ;;  %s1674_s17 = smov 64   ;;  %s56_s16 = int_to_ptr.vmem [resolvable:$true] %s55_s16 }
   0x9   :  { %s1675_s18 = smov 4  }
   0xa   :  { %61 = dma.hbm_to_vmem [thread:$0]  %s54_s15, 3072, %s56_s16, [#allocation6], %s1674_s17, %s1674_s17, %s1675_s18  }
   0xb   :  { %1665 = dma.done.wait [#allocation4], 2048  }
   0xc   :  { %1666 = vsyncadd [#allocation4], 4294965248 }
   0xd   :  { %1667 = dma.done.wait [#allocation6], 7168  }
   0xe   :  { %1668 = vsyncadd [#allocation6], 4294960128  ;;  %v124_v0 = vld [vmem:[#allocation3 + $0x78] sm:$0xff]  ;;  %v123_v1 = vld [vmem:[#allocation3 + $0x70] sm:$0xff] }
   0xf   :  { %v122_v2 = vld [vmem:[#allocation3 + $0x68] sm:$0xff]  ;;  %v1725_v3 = vand.u32 4294901760, %v124_v0  ;;  %v1727_v4 = vand.u32 4294901760, %v123_v1  ;;  %v121_v5 = vld [vmem:[#allocation3 + $0x60] sm:$0xff]  ;;  %v120_v8 = vld [vmem:[#allocation3 + $0x58] sm:$0xff] }
  0x10   :  { %v1730_v6 = vand.u32 4294901760, %v122_v2  ;;  %v1740_v10 = vand.u32 4294901760, %v121_v5  ;;  %v119_v11 = vld [vmem:[#allocation3 + $0x50] sm:$0xff]  ;;  %v1749_v14 = vand.u32 4294901760, %v120_v8  ;;  %v118_v15 = vld [vmem:[#allocation3 + $0x48] sm:$0xff]  ;;  %v117_v19 = vld [vmem:[#allocation3 + $0x40] sm:$0xff] }
  0x11   :  { %130 = vmatpush.msra.mxu1 %v1725_v3  ;;  %v1733_v7 = vsub.f32 %v124_v0, %v1725_v3  ;;  %326 = vmatpush.msra.mxu3 %v1725_v3  ;;  %v1737_v9 = vsub.f32 %v123_v1, %v1727_v4  ;;  %v1760_v18 = vand.u32 4294901760, %v119_v11  ;;  %v1771_v22 = vand.u32 4294901760, %v118_v15  ;;  %v116_v23 = vld [vmem:[#allocation3 + $0x38] sm:$0xff]  ;;  %v115_v27 = vld [vmem:[#allocation3 + $0x30] sm:$0xff]  ;;  %v114_v31 = vld [vmem:[#allocation3 + $0x28] sm:$0xff] }
  0x12   :  { %v1745_v13 = vsub.f32 %v122_v2, %v1730_v6  ;;  %v1754_v17 = vsub.f32 %v121_v5, %v1740_v10  ;;  %v1765_v21 = vsub.f32 %v120_v8, %v1749_v14  ;;  %v1782_v26 = vand.u32 4294901760, %v117_v19  ;;  %v106_v34 = vld [vmem:[%s2458_s0] sm:$0xff]  ;;  %v112_v42 = vld [vmem:[#allocation3 + $0x18] sm:$0xff]  ;;  %v111_v46 = vld [vmem:[#allocation3 + $0x10] sm:$0xff] }
  0x13   :  { %132 = vmatpush.msra.mxu1 %v1727_v4  ;;  %273 = vmatpush.msra.mxu2 %v1733_v7  ;;  %v172_v12 = vand.u32 4294901760, %v1733_v7  ;;  %v178_v16 = vand.u32 4294901760, %v1737_v9  ;;  %v1776_v25 = vsub.f32 %v119_v11, %v1760_v18  ;;  %v1787_v29 = vsub.f32 %v118_v15, %v1771_v22  ;;  %v113_v37 = vld [vmem:[#allocation3 + $0x20] sm:$0xff]  ;;  %v110_v51 = vld [vmem:[#allocation3 + $0x8] sm:$0xff] }
  0x14   :  { %328 = vmatpush.msra.mxu3 %v1727_v4  ;;  %v184_v20 = vand.u32 4294901760, %v1745_v13  ;;  %v190_v24 = vand.u32 4294901760, %v1754_v17  ;;  %v196_v28 = vand.u32 4294901760, %v1765_v21  ;;  %v1793_v30 = vand.u32 4294901760, %v116_v23  ;;  %v109_v55 = vld [vmem:[#allocation3] sm:$0xff] }
  0x15   :  { %134 = vmatpush.msra.mxu1 %v1730_v6  ;;  %276 = vmatpush.msra.mxu2 %v1737_v9  ;;  %v202_v32 = vand.u32 4294901760, %v1776_v25  ;;  %v1798_v33 = vsub.f32 %v117_v19, %v1782_v26  ;;  %v1807_v35 = vand.u32 4294901760, %v115_v27  ;;  %v1810_v36 = vand.u32 4294901760, %v106_v34 }
  0x16   :  { %330 = vmatpush.msra.mxu3 %v1730_v6  ;;  %367 = vmatpush.msra.mxu0 %v172_v12  ;;  %v208_v38 = vand.u32 4294901760, %v1787_v29  ;;  %v1814_v39 = vsub.f32 %v116_v23, %v1793_v30  ;;  %v1820_v40 = vand.u32 4294901760, %v114_v31  ;;  %v1834_v45 = vand.u32 4294901760, %v113_v37 }
  0x17   :  { %136 = vmatpush.msra.mxu1 %v1740_v10  ;;  %279 = vmatpush.msra.mxu2 %v1745_v13  ;;  %v1824_v41 = vsub.f32 %v106_v34, %v1810_v36  ;;  %v214_v43 = vand.u32 4294901760, %v1798_v33  ;;  %v1828_v44 = vsub.f32 %v115_v27, %v1807_v35  ;;  %v1845_v49 = vand.u32 4294901760, %v112_v42 }
  0x18   :  { %332 = vmatpush.msra.mxu3 %v1740_v10  ;;  %371 = vmatpush.msra.mxu0 %v178_v16  ;;  %v220_v47 = vand.u32 4294901760, %v1814_v39  ;;  %v1839_v48 = vsub.f32 %v114_v31, %v1820_v40  ;;  %v1853_v53 = vsub.f32 %v113_v37, %v1834_v45  ;;  %v1859_v54 = vand.u32 4294901760, %v111_v46 }
  0x19   :  { %138 = vmatpush.msra.mxu1 %v1749_v14  ;;  %282 = vmatpush.msra.mxu2 %v1754_v17  ;;  %v1849_v50 = vand.u32 4294901760, %v1824_v41  ;;  %v226_v52 = vand.u32 4294901760, %v1828_v44  ;;  %v173_v56 = vsub.f32 %v1733_v7, %v172_v12  ;;  %v1867_v58 = vsub.f32 %v112_v42, %v1845_v49 }
  0x1a   :  { %334 = vmatpush.msra.mxu3 %v1749_v14  ;;  %375 = vmatpush.msra.mxu0 %v184_v20  ;;  %v232_v57 = vand.u32 4294901760, %v1839_v48  ;;  %v1873_v59 = vand.u32 4294901760, %v110_v51  ;;  %v179_v61 = vsub.f32 %v1737_v9, %v178_v16  ;;  %v238_v62 = vand.u32 4294901760, %v1853_v53 }
  0x1b   :  { %140 = vmatpush.msra.mxu1 %v1760_v18  ;;  %285 = vmatpush.msra.mxu2 %v1765_v21  ;;  %v164_v60 = vsub.f32 %v1824_v41, %v1849_v50  ;;  %v1886_v63 = vand.u32 4294901760, %v109_v55  ;;  %v249_v0 = vsub.f32 %v111_v46, %v1859_v54  ;;  %v174_v1 = vand.u32 4294901760, %v173_v56  ;;  %v487_v56 = vld [vmem:[#allocation5 + $0x70] sm:$0xff] }
  0x1c   :  { %336 = vmatpush.msra.mxu3 %v1760_v18  ;;  %379 = vmatpush.msra.mxu0 %v190_v24  ;;  %v185_v2 = vsub.f32 %v1745_v13, %v184_v20  ;;  %v244_v5 = vand.u32 4294901760, %v1867_v58  ;;  %v255_v8 = vsub.f32 %v110_v51, %v1873_v59  ;;  %v180_v9 = vand.u32 4294901760, %v179_v61 }
  0x1d   :  { %142 = vmatpush.msra.mxu1 %v1771_v22  ;;  %288 = vmatpush.msra.mxu2 %v1776_v25  ;;  %v1896_v7 = vand.u32 4294901760, %v164_v60  ;;  %v191_v11 = vsub.f32 %v1754_v17, %v190_v24  ;;  %v261_v12 = vsub.f32 %v109_v55, %v1886_v63  ;;  %v197_v15 = vsub.f32 %v1765_v21, %v196_v28 }
  0x1e   :  { %338 = vmatpush.msra.mxu3 %v1771_v22  ;;  %383 = vmatpush.msra.mxu0 %v196_v28  ;;  %v186_v13 = vand.u32 4294901760, %v185_v2  ;;  %v250_v16 = vand.u32 4294901760, %v249_v0  ;;  %v203_v19 = vsub.f32 %v1776_v25, %v202_v32  ;;  %v256_v20 = vand.u32 4294901760, %v255_v8 }
  0x1f   :  { %144 = vmatpush.msra.mxu1 %v1782_v26  ;;  %291 = vmatpush.msra.mxu2 %v1787_v29  ;;  %v192_v17 = vand.u32 4294901760, %v191_v11  ;;  %v198_v21 = vand.u32 4294901760, %v197_v15  ;;  %v209_v23 = vsub.f32 %v1787_v29, %v208_v38  ;;  %v262_v24 = vand.u32 4294901760, %v261_v12  ;;  %v481_v11 = vld [vmem:[#allocation5 + $0x40] sm:$0xff] }
  0x20   :  { %340 = vmatpush.msra.mxu3 %v1782_v26  ;;  %387 = vmatpush.msra.mxu0 %v202_v32  ;;  %v204_v27 = vand.u32 4294901760, %v203_v19  ;;  %v215_v25 = vsub.f32 %v1798_v33, %v214_v43  ;;  %v221_v31 = vsub.f32 %v1814_v39, %v220_v47  ;;  %v227_v29 = vsub.f32 %v1828_v44, %v226_v52 }
  0x21   :  { %146 = vmatpush.msra.mxu1 %v1793_v30  ;;  %294 = vmatpush.msra.mxu2 %v1798_v33  ;;  %v210_v28 = vand.u32 4294901760, %v209_v23  ;;  %v233_v33 = vsub.f32 %v1839_v48, %v232_v57  ;;  %v245_v42 = vsub.f32 %v1867_v58, %v244_v5  ;;  %v251_v46 = vsub.f32 %v249_v0, %v250_v16 }
  0x22   :  { %342 = vmatpush.msra.mxu3 %v1793_v30  ;;  %391 = vmatpush.msra.mxu0 %v208_v38  ;;  %v216_v32 = vand.u32 4294901760, %v215_v25  ;;  %v222_v34 = vand.u32 4294901760, %v221_v31  ;;  %v228_v37 = vand.u32 4294901760, %v227_v29  ;;  %v239_v38 = vsub.f32 %v1853_v53, %v238_v62  ;;  %v480_v29 = vld [vmem:[#allocation5 + $0x38] sm:$0xff] }
  0x23   :  { %148 = vmatpush.msra.mxu1 %v1807_v35  ;;  %297 = vmatpush.msra.mxu2 %v1814_v39  ;;  %v234_v39 = vand.u32 4294901760, %v233_v33  ;;  %v252_v51 = vand.u32 4294901760, %v251_v46  ;;  %v1936_v60 = vand.u32 4294901760, %v487_v56  ;;  %v1974_v23 = vand.u32 4294901760, %v481_v11 }
  0x24   :  { %344 = vmatpush.msra.mxu3 %v1807_v35  ;;  %395 = vmatpush.msra.mxu0 %v214_v43  ;;  %v240_v43 = vand.u32 4294901760, %v239_v38 }
  0x25   :  { %150 = vmatpush.msra.mxu1 %v1820_v40  ;;  %300 = vmatpush.msra.mxu2 %v1828_v44  ;;  %v257_v44 = vsub.f32 %v255_v8, %v256_v20  ;;  %v2001_v38 = vsub.f32 %v481_v11, %v1974_v23 }
  0x26   :  { %346 = vmatpush.msra.mxu3 %v1820_v40  ;;  %399 = vmatpush.msra.mxu0 %v220_v47  ;;  %v246_v47 = vand.u32 4294901760, %v245_v42 }
  0x27   :  { %152 = vmatpush.msra.mxu1 %v1834_v45  ;;  %303 = vmatpush.msra.mxu2 %v1839_v48  ;;  %v258_v55 = vand.u32 4294901760, %v257_v44  ;;  %v594_v44 = vand.u32 4294901760, %v2001_v38 }
  0x28   :  { %348 = vmatpush.msra.mxu3 %v1834_v45  ;;  %403 = vmatpush.msra.mxu0 %v226_v52  ;;  %v263_v52 = vsub.f32 %v261_v12, %v262_v24 }
  0x29   :  { %154 = vmatpush.msra.mxu1 %v1845_v49  ;;  %306 = vmatpush.msra.mxu2 %v1853_v53  ;;  %v488_v53 = vld [vmem:[#allocation5 + $0x78] sm:$0xff] }
  0x2a   :  { %350 = vmatpush.msra.mxu3 %v1845_v49  ;;  %407 = vmatpush.msra.mxu0 %v232_v57  ;;  %v264_v48 = vand.u32 4294901760, %v263_v52  ;;  %v486_v57 = vld [vmem:[#allocation5 + $0x68] sm:$0xff] }
  0x2b   :  { %156 = vmatpush.msra.mxu1 %v1859_v54  ;;  %309 = vmatpush.msra.mxu2 %v1867_v58  ;;  %v1934_v58 = vand.u32 4294901760, %v488_v53  ;;  %v1938_v61 = vand.u32 4294901760, %v486_v57 }
  0x2c   :  { %352 = vmatpush.msra.mxu3 %v1859_v54  ;;  %411 = vmatpush.msra.mxu0 %v238_v62  ;;  %v485_v62 = vld [vmem:[#allocation5 + $0x60] sm:$0xff] }
  0x2d   :  { %158 = vmatpush.msra.mxu1 %v1873_v59  ;;  %312 = vmatpush.msra.mxu2 %v249_v0  ;;  %v484_v0 = vld [vmem:[#allocation5 + $0x58] sm:$0xff]  ;;  %v1941_v2 = vand.u32 4294901760, %v485_v62 }
  0x2e   :  { %354 = vmatpush.msra.mxu3 %v1873_v59  ;;  %415 = vmatpush.msra.mxu0 %v244_v5  ;;  %v1943_v5 = vand.u32 4294901760, %v484_v0 }
  0x2f   :  { %160 = vmatpush.msra.mxu1 %v1886_v63  ;;  %315 = vmatpush.msra.mxu2 %v255_v8 }
  0x30   :  { %356 = vmatpush.msra.mxu3 %v1886_v63  ;;  %166 = vmatmul.f32.vlgmr.msra.gmra.mxu1 %v1896_v7 }
  0x31   :  { %175 = vmatpush.msrb.mxu1 %v174_v1  ;;  %318 = vmatpush.msra.mxu2 %v261_v12  ;;  %v483_v1 = vld [vmem:[#allocation5 + $0x50] sm:$0xff]  ;;  %v1952_v12 = vsub.f32 %v487_v56, %v1936_v60 }
  0x32   :  { %321 = vmatmul.f32.vlgmr.msra.gmra.mxu2 %v1824_v41  ;;  %360 = vmatmul.f32.vlgmr.msra.gmra.mxu3 %v1849_v50  ;;  %v1945_v8 = vand.u32 4294901760, %v483_v1 }
  0x33   :  { %181 = vmatpush.msrb.mxu1 %v180_v9  ;;  %419 = vmatpush.msra.mxu0 %v250_v16  ;;  %v482_v9 = vld [vmem:[#allocation5 + $0x48] sm:$0xff]  ;;  %v1961_v16 = vsub.f32 %v485_v62, %v1941_v2 }
  0x34   :  { %510 = vmatpush.msrb.mxu2 %v1934_v58  ;;  %v1958_v15 = vand.u32 4294901760, %v482_v9 }
  0x35   :  { %187 = vmatpush.msrb.mxu1 %v186_v13  ;;  %423 = vmatpush.msra.mxu0 %v256_v20  ;;  %v1955_v13 = vsub.f32 %v486_v57, %v1938_v61  ;;  %v558_v20 = vand.u32 4294901760, %v1952_v12 }
  0x36   :  { %512 = vmatpush.msrb.mxu2 %v1936_v60 }
  0x37   :  { %193 = vmatpush.msrb.mxu1 %v192_v17  ;;  %427 = vmatpush.msra.mxu0 %v262_v24  ;;  %v1964_v17 = vsub.f32 %v484_v0, %v1943_v5  ;;  %v570_v24 = vand.u32 4294901760, %v1961_v16  ;;  %v559_v25 = vsub.f32 %v1952_v12, %v558_v20 }
  0x38   :  { %429 = vmatmul.f32.vlgmr.msra.gmra.mxu0 %v1810_v36  ;;  %514 = vmatpush.msrb.mxu2 %v1938_v61 }
  0x39   :  { %199 = vmatpush.msrb.mxu1 %v198_v21  ;;  %v564_v21 = vand.u32 4294901760, %v1955_v13  ;;  %v576_v31 = vand.u32 4294901760, %v1964_v17  ;;  %v560_v33 = vand.u32 4294901760, %v559_v25 }
  0x3a   :  { %516 = vmatpush.msrb.mxu2 %v1941_v2 }
  0x3b   :  { %205 = vmatpush.msrb.mxu1 %v204_v27  ;;  %v1978_v27 = vsub.f32 %v482_v9, %v1958_v15  ;;  %v475_v9 = vld [vmem:[#allocation5 + $0x10] sm:$0xff] }
  0x3c   :  { %518 = vmatpush.msrb.mxu2 %v1943_v5  ;;  %v2077_v11 = vand.u32 4294901760, %v475_v9 }
  0x3d   :  { %211 = vmatpush.msrb.mxu1 %v210_v28  ;;  %v565_v28 = vsub.f32 %v1955_v13, %v564_v21 }
  0x3e   :  { %520 = vmatpush.msrb.mxu2 %v1945_v8 }
  0x3f   :  { %217 = vmatpush.msrb.mxu1 %v216_v32  ;;  %v566_v42 = vand.u32 4294901760, %v565_v28 }
  0x40   :  { %522 = vmatpush.msrb.mxu2 %v1958_v15 }
  0x41   :  { %223 = vmatpush.msrb.mxu1 %v222_v34 }
  0x42   :  { %524 = vmatpush.msrb.mxu2 %v1974_v23 }
  0x43   :  { %229 = vmatpush.msrb.mxu1 %v228_v37  ;;  %v571_v37 = vsub.f32 %v1961_v16, %v570_v24 }
  0x45   :  { %235 = vmatpush.msrb.mxu1 %v234_v39  ;;  %v588_v39 = vand.u32 4294901760, %v1978_v27 }
  0x47   :  { %241 = vmatpush.msrb.mxu1 %v240_v43  ;;  %v2009_v43 = vand.u32 4294901760, %v480_v29 }
  0x49   :  { %247 = vmatpush.msrb.mxu1 %v246_v47  ;;  %526 = vmatpush.msrb.mxu2 %v2009_v43 }
  0x4b   :  { %253 = vmatpush.msrb.mxu1 %v252_v51  ;;  %v2021_v51 = vsub.f32 %v480_v29, %v2009_v43  ;;  %v2091_v29 = vsub.f32 %v475_v9, %v2077_v11 }
  0x4d   :  { %259 = vmatpush.msrb.mxu1 %v258_v55 }
  0x4f   :  { %265 = vmatpush.msrb.mxu1 %v264_v48  ;;  %v600_v48 = vand.u32 4294901760, %v2021_v51 }
  0x50   :  { %267 = vmatmul.f32.vlgmr.msrb.gmra.mxu1 %v1810_v36 }
  0x51   :  { %434 = vmatpush.msra.mxu1 %v1725_v3  ;;  %v1949_v3 = vsub.f32 %v488_v53, %v1934_v58 }
  0x53   :  { %436 = vmatpush.msra.mxu1 %v1727_v4  ;;  %v1967_v4 = vsub.f32 %v483_v1, %v1945_v8  ;;  %v552_v19 = vand.u32 4294901760, %v1949_v3  ;;  %653 = vmatpush.msrb.mxu0 %v1949_v3 }
  0x55   :  { %438 = vmatpush.msra.mxu1 %v1730_v6  ;;  %v553_v6 = vsub.f32 %v1949_v3, %v552_v19  ;;  %v582_v32 = vand.u32 4294901760, %v1967_v4  ;;  %656 = vmatpush.msrb.mxu0 %v1952_v12  ;;  %v504_v12 = vld [vmem:[#allocation5 + $0xf8] sm:$0xff] }
  0x57   :  { %440 = vmatpush.msra.mxu1 %v1740_v10  ;;  %v479_v10 = vld [vmem:[#allocation5 + $0x30] sm:$0xff]  ;;  %v554_v34 = vand.u32 4294901760, %v553_v6  ;;  %659 = vmatpush.msrb.mxu0 %v1955_v13  ;;  %v583_v47 = vsub.f32 %v1967_v4, %v582_v32  ;;  %v502_v13 = vld [vmem:[#allocation5 + $0xe8] sm:$0xff] }
  0x58   :  { %v2011_v46 = vand.u32 4294901760, %v479_v10 }
  0x59   :  { %442 = vmatpush.msra.mxu1 %v1749_v14  ;;  %555 = vmatpush.msrb.mxu3 %v554_v34  ;;  %v577_v14 = vsub.f32 %v1964_v17, %v576_v31  ;;  %v584_v53 = vand.u32 4294901760, %v583_v47 }
  0x5a   :  { %662 = vmatpush.msrb.mxu0 %v1961_v16  ;;  %v2024_v52 = vsub.f32 %v479_v10, %v2011_v46  ;;  %528 = vmatpush.msrb.mxu2 %v2011_v46 }
  0x5b   :  { %444 = vmatpush.msra.mxu1 %v1760_v18  ;;  %561 = vmatpush.msrb.mxu3 %v560_v33  ;;  %v572_v18 = vand.u32 4294901760, %v571_v37  ;;  %v578_v55 = vand.u32 4294901760, %v577_v14  ;;  %v630_v37 = vand.u32 4294901760, %v2091_v29 }
  0x5c   :  { %665 = vmatpush.msrb.mxu0 %v1964_v17  ;;  %v606_v56 = vand.u32 4294901760, %v2024_v52 }
  0x5d   :  { %446 = vmatpush.msra.mxu1 %v1771_v22  ;;  %567 = vmatpush.msrb.mxu3 %v566_v42  ;;  %v589_v22 = vsub.f32 %v1978_v27, %v588_v39 }
  0x5e   :  { %668 = vmatpush.msrb.mxu0 %v1967_v4  ;;  %v607_v0 = vsub.f32 %v2024_v52, %v606_v56  ;;  %v501_v4 = vld [vmem:[#allocation5 + $0xe0] sm:$0xff] }
  0x5f   :  { %448 = vmatpush.msra.mxu1 %v1782_v26  ;;  %573 = vmatpush.msrb.mxu3 %v572_v18  ;;  %v595_v26 = vsub.f32 %v2001_v38, %v594_v44  ;;  %v590_v57 = vand.u32 4294901760, %v589_v22  ;;  %v631_v22 = vsub.f32 %v2091_v29, %v630_v37 }
  0x60   :  { %671 = vmatpush.msrb.mxu0 %v1978_v27 }
  0x61   :  { %450 = vmatpush.msra.mxu1 %v1793_v30  ;;  %579 = vmatpush.msrb.mxu3 %v578_v55  ;;  %v601_v30 = vsub.f32 %v2021_v51, %v600_v48  ;;  %v596_v62 = vand.u32 4294901760, %v595_v26  ;;  %v632_v26 = vand.u32 4294901760, %v631_v22  ;;  %v495_v22 = vld [vmem:[#allocation5 + $0xb0] sm:$0xff] }
  0x62   :  { %674 = vmatpush.msrb.mxu0 %v2001_v38 }
  0x63   :  { %452 = vmatpush.msra.mxu1 %v1807_v35  ;;  %585 = vmatpush.msrb.mxu3 %v584_v53  ;;  %v602_v35 = vand.u32 4294901760, %v601_v30 }
  0x64   :  { %677 = vmatpush.msrb.mxu0 %v2021_v51 }
  0x65   :  { %454 = vmatpush.msra.mxu1 %v1820_v40  ;;  %591 = vmatpush.msrb.mxu3 %v590_v57  ;;  %v608_v40 = vand.u32 4294901760, %v607_v0  ;;  %v474_v57 = vld [vmem:[#allocation5 + $0x8] sm:$0xff] }
  0x66   :  { %680 = vmatpush.msrb.mxu0 %v2024_v52  ;;  %v2119_v30 = vand.u32 4294901760, %v474_v57 }
  0x67   :  { %456 = vmatpush.msra.mxu1 %v1834_v45  ;;  %597 = vmatpush.msrb.mxu3 %v596_v62  ;;  %v478_v45 = vld [vmem:[#allocation5 + $0x28] sm:$0xff]  ;;  %v473_v62 = vld [vmem:[#allocation5] sm:$0xff] }
  0x68   :  { %v2122_v0 = vsub.f32 %v474_v57, %v2119_v30  ;;  %v2270_v57 = vand.u32 4294901760, %v495_v22 }
  0x69   :  { %458 = vmatpush.msra.mxu1 %v1845_v49  ;;  %603 = vmatpush.msrb.mxu3 %v602_v35  ;;  %v477_v49 = vld [vmem:[#allocation5 + $0x20] sm:$0xff]  ;;  %v2124_v35 = vand.u32 4294901760, %v473_v62 }
  0x6b   :  { %460 = vmatpush.msra.mxu1 %v1859_v54  ;;  %609 = vmatpush.msrb.mxu3 %v608_v40  ;;  %v476_v54 = vld [vmem:[#allocation5 + $0x18] sm:$0xff]  ;;  %v636_v40 = vand.u32 4294901760, %v2122_v0 }
  0x6c   :  { %v2075_v1 = vand.u32 4294901760, %v476_v54 }
  0x6d   :  { %462 = vmatpush.msra.mxu1 %v1873_v59  ;;  %v2071_v59 = vand.u32 4294901760, %v478_v45 }
  0x6e   :  { %v2086_v28 = vsub.f32 %v476_v54, %v2075_v1 }
  0x6f   :  { %464 = vmatpush.msra.mxu1 %v1886_v63  ;;  %v2073_v63 = vand.u32 4294901760, %v477_v49  ;;  %v2080_v6 = vsub.f32 %v478_v45, %v2071_v59  ;;  %530 = vmatpush.msrb.mxu2 %v2071_v59  ;;  %v2130_v45 = vsub.f32 %v473_v62, %v2124_v35 }
  0x70   :  { %466 = vmatmul.f32.vlgmr.msra.gmra.mxu1 %v1810_v36  ;;  %v624_v33 = vand.u32 4294901760, %v2086_v28 }
  0x71   :  { %706 = vmatpush.msrb.mxu1 %v1934_v58  ;;  %v2083_v25 = vsub.f32 %v477_v49, %v2073_v63  ;;  %v612_v10 = vand.u32 4294901760, %v2080_v6  ;;  %532 = vmatpush.msrb.mxu2 %v2073_v63  ;;  %v637_v49 = vsub.f32 %v2122_v0, %v636_v40  ;;  %v642_v54 = vand.u32 4294901760, %v2130_v45 }
  0x72   :  { %683 = vmatpush.msrb.mxu0 %v2080_v6  ;;  %v625_v47 = vsub.f32 %v2086_v28, %v624_v33 }
  0x73   :  { %708 = vmatpush.msrb.mxu1 %v1936_v60  ;;  %v618_v34 = vand.u32 4294901760, %v2083_v25  ;;  %v613_v42 = vsub.f32 %v2080_v6, %v612_v10  ;;  %534 = vmatpush.msrb.mxu2 %v2075_v1  ;;  %v638_v9 = vand.u32 4294901760, %v637_v49 }
  0x74   :  { %686 = vmatpush.msrb.mxu0 %v2083_v25  ;;  %v626_v53 = vand.u32 4294901760, %v625_v47 }
  0x75   :  { %710 = vmatpush.msrb.mxu1 %v1938_v61  ;;  %v619_v14 = vsub.f32 %v2083_v25, %v618_v34  ;;  %v614_v18 = vand.u32 4294901760, %v613_v42  ;;  %536 = vmatpush.msrb.mxu2 %v2077_v11  ;;  %v643_v42 = vsub.f32 %v2130_v45, %v642_v54 }
  0x76   :  { %689 = vmatpush.msrb.mxu0 %v2086_v28 }
  0x77   :  { %712 = vmatpush.msrb.mxu1 %v1941_v2  ;;  %v620_v55 = vand.u32 4294901760, %v619_v14  ;;  %615 = vmatpush.msrb.mxu3 %v614_v18  ;;  %v644_v3 = vand.u32 4294901760, %v643_v42  ;;  %v496_v14 = vld [vmem:[#allocation5 + $0xb8] sm:$0xff] }
  0x78   :  { %692 = vmatpush.msrb.mxu0 %v2091_v29  ;;  %538 = vmatpush.msrb.mxu2 %v2119_v30  ;;  %v2259_v18 = vand.u32 4294901760, %v496_v14 }
  0x79   :  { %714 = vmatpush.msrb.mxu1 %v1943_v5  ;;  %621 = vmatpush.msrb.mxu3 %v620_v55 }
  0x7a   :  { %540 = vmatpush.msrb.mxu2 %v2124_v35  ;;  %695 = vmatpush.msrb.mxu0 %v2122_v0  ;;  %v2274_v62 = vsub.f32 %v496_v14, %v2259_v18 }
  0x7b   :  { %716 = vmatpush.msrb.mxu1 %v1945_v8  ;;  %627 = vmatpush.msrb.mxu3 %v626_v53 }
  0x7c   :  { %747 = vmatpush.msra.mxu2 %v552_v19  ;;  %698 = vmatpush.msrb.mxu0 %v2130_v45  ;;  %v503_v19 = vld [vmem:[#allocation5 + $0xf0] sm:$0xff] }
  0x7d   :  { %718 = vmatpush.msrb.mxu1 %v1958_v15  ;;  %633 = vmatpush.msrb.mxu3 %v632_v26  ;;  %v2162_v16 = vand.u32 4294901760, %v503_v19 }
  0x7e   :  { %751 = vmatpush.msra.mxu2 %v558_v20  ;;  %v2158_v20 = vand.u32 4294901760, %v504_v12 }
  0x7f   :  { %720 = vmatpush.msrb.mxu1 %v1974_v23  ;;  %639 = vmatpush.msrb.mxu3 %v638_v9  ;;  %v2172_v17 = vsub.f32 %v503_v19, %v2162_v16  ;;  %v2284_v9 = vsub.f32 %v495_v22, %v2270_v57 }
  0x80   :  { %755 = vmatpush.msra.mxu2 %v564_v21  ;;  %851 = vmatpush.msra.mxu0 %v2158_v20 }
  0x81   :  { %722 = vmatpush.msrb.mxu1 %v2009_v43  ;;  %645 = vmatpush.msrb.mxu3 %v644_v3  ;;  %v899_v21 = vand.u32 4294901760, %v2172_v17 }
  0x82   :  { %759 = vmatpush.msra.mxu2 %v570_v24  ;;  %853 = vmatpush.msra.mxu0 %v2162_v16 }
  0x83   :  { %724 = vmatpush.msrb.mxu1 %v2011_v46  ;;  %814 = vmatpush.msra.mxu3 %v1934_v58  ;;  %v2164_v58 = vand.u32 4294901760, %v502_v13 }
  0x84   :  { %763 = vmatpush.msra.mxu2 %v576_v31  ;;  %v2194_v31 = vand.u32 4294901760, %v501_v4 }
  0x85   :  { %726 = vmatpush.msrb.mxu1 %v2071_v59  ;;  %816 = vmatpush.msra.mxu3 %v1936_v60  ;;  %v2169_v60 = vsub.f32 %v504_v12, %v2158_v20 }
  0x86   :  { %767 = vmatpush.msra.mxu2 %v582_v32  ;;  %855 = vmatpush.msra.mxu0 %v2164_v58  ;;  %v2215_v51 = vsub.f32 %v501_v4, %v2194_v31  ;;  %v492_v4 = vld [vmem:[#allocation5 + $0x98] sm:$0xff] }
  0x87   :  { %728 = vmatpush.msrb.mxu1 %v2073_v63  ;;  %818 = vmatpush.msra.mxu3 %v1938_v61  ;;  %v2175_v61 = vsub.f32 %v502_v13, %v2164_v58  ;;  %v947_v13 = vand.u32 4294901760, %v2284_v9 }
  0x88   :  { %771 = vmatpush.msra.mxu2 %v588_v39  ;;  %857 = vmatpush.msra.mxu0 %v2194_v31 }
  0x89   :  { %730 = vmatpush.msrb.mxu1 %v2075_v1  ;;  %820 = vmatpush.msra.mxu3 %v1941_v2  ;;  %v893_v2 = vand.u32 4294901760, %v2169_v60  ;;  %v905_v24 = vand.u32 4294901760, %v2175_v61 }
  0x8a   :  { %775 = vmatpush.msra.mxu2 %v594_v44  ;;  %v500_v44 = vld [vmem:[#allocation5 + $0xd8] sm:$0xff] }
  0x8b   :  { %732 = vmatpush.msrb.mxu1 %v2077_v11  ;;  %822 = vmatpush.msra.mxu3 %v1943_v5  ;;  %v894_v27 = vsub.f32 %v2169_v60, %v893_v2  ;;  %v900_v5 = vsub.f32 %v2172_v17, %v899_v21  ;;  %v906_v32 = vsub.f32 %v2175_v61, %v905_v24 }
  0x8c   :  { %779 = vmatpush.msra.mxu2 %v600_v48  ;;  %v498_v48 = vld [vmem:[#allocation5 + $0xc8] sm:$0xff] }
  0x8d   :  { %734 = vmatpush.msrb.mxu1 %v2119_v30  ;;  %824 = vmatpush.msra.mxu3 %v1945_v8  ;;  %v895_v8 = vand.u32 4294901760, %v894_v27  ;;  %v901_v38 = vand.u32 4294901760, %v900_v5  ;;  %v907_v39 = vand.u32 4294901760, %v906_v32  ;;  %v2235_v6 = vand.u32 4294901760, %v498_v48 }
  0x8e   :  { %783 = vmatpush.msra.mxu2 %v606_v56  ;;  %v2298_v5 = vand.u32 4294901760, %v492_v4 }
  0x8f   :  { %736 = vmatpush.msrb.mxu1 %v2124_v35  ;;  %826 = vmatpush.msra.mxu3 %v1958_v15  ;;  %v2212_v15 = vand.u32 4294901760, %v500_v44 }
  0x90   :  { %787 = vmatpush.msra.mxu2 %v612_v10  ;;  %v497_v10 = vld [vmem:[#allocation5 + $0xc0] sm:$0xff] }
  0x91   :  { %828 = vmatpush.msra.mxu3 %v1974_v23  ;;  %896 = vmatpush.msra.mxu1 %v895_v8  ;;  %v499_v23 = vld [vmem:[#allocation5 + $0xd0] sm:$0xff]  ;;  %v1589_v8 = vld [vmem:[%s2460_s2] ss:$0 sm:$0xff] }
  0x92   :  { %791 = vmatpush.msra.mxu2 %v618_v34  ;;  %859 = vmatpush.msra.mxu0 %v2212_v15  ;;  %v2222_v52 = vand.u32 4294901760, %v499_v23  ;;  %v2248_v34 = vand.u32 4294901760, %v497_v10 }
  0x93   :  { %830 = vmatpush.msra.mxu3 %v2009_v43  ;;  %902 = vmatpush.msra.mxu1 %v901_v38  ;;  %v911_v43 = vand.u32 4294901760, %v2215_v51 }
  0x94   :  { %795 = vmatpush.msra.mxu2 %v624_v33  ;;  %861 = vmatpush.msra.mxu0 %v2222_v52  ;;  %v2238_v25 = vsub.f32 %v499_v23, %v2222_v52  ;;  %v2251_v33 = vsub.f32 %v498_v48, %v2235_v6  ;;  %v2262_v55 = vsub.f32 %v497_v10, %v2248_v34  ;;  %v490_v10 = vld [vmem:[#allocation5 + $0x88] sm:$0xff] }
  0x95   :  { %832 = vmatpush.msra.mxu3 %v2011_v46  ;;  %908 = vmatpush.msra.mxu1 %v907_v39  ;;  %v2225_v46 = vsub.f32 %v500_v44, %v2212_v15  ;;  %v912_v56 = vsub.f32 %v2215_v51, %v911_v43  ;;  %v948_v39 = vsub.f32 %v2284_v9, %v947_v13  ;;  %v491_v44 = vld [vmem:[#allocation5 + $0x90] sm:$0xff] }
  0x96   :  { %799 = vmatpush.msra.mxu2 %v630_v37  ;;  %863 = vmatpush.msra.mxu0 %v2235_v6  ;;  %v923_v29 = vand.u32 4294901760, %v2238_v25  ;;  %v929_v47 = vand.u32 4294901760, %v2251_v33  ;;  %v935_v26 = vand.u32 4294901760, %v2262_v55 }
  0x97   :  { %834 = vmatpush.msra.mxu3 %v2071_v59  ;;  %v917_v59 = vand.u32 4294901760, %v2225_v46  ;;  %v913_v28 = vand.u32 4294901760, %v912_v56  ;;  %v2314_v56 = vand.u32 4294901760, %v491_v44 }
  0x98   :  { %803 = vmatpush.msra.mxu2 %v636_v40  ;;  %865 = vmatpush.msra.mxu0 %v2248_v34  ;;  %v930_v53 = vsub.f32 %v2251_v33, %v929_v47  ;;  %v936_v40 = vsub.f32 %v2262_v55, %v935_v26 }
  0x99   :  { %836 = vmatpush.msra.mxu3 %v2073_v63  ;;  %v918_v63 = vsub.f32 %v2225_v46, %v917_v59  ;;  %914 = vmatpush.msra.mxu1 %v913_v28  ;;  %v2317_v28 = vsub.f32 %v492_v4, %v2298_v5 }
  0x9a   :  { %807 = vmatpush.msra.mxu2 %v642_v54  ;;  %867 = vmatpush.msra.mxu0 %v2259_v18  ;;  %v931_v0 = vand.u32 4294901760, %v930_v53  ;;  %v941_v54 = vand.u32 4294901760, %v2274_v62  ;;  %v937_v42 = vand.u32 4294901760, %v936_v40  ;;  %v2327_v53 = vsub.f32 %v491_v44, %v2314_v56 }
  0x9b   :  { %838 = vmatpush.msra.mxu3 %v2075_v1  ;;  %v919_v37 = vand.u32 4294901760, %v918_v63  ;;  %v924_v1 = vsub.f32 %v2238_v25, %v923_v29  ;;  %v949_v63 = vand.u32 4294901760, %v948_v39  ;;  %v2466_v14 = vand.u32 4294901760, %v2317_v28 }
  0x9c   :  { %869 = vmatpush.msra.mxu0 %v2270_v57  ;;  %v942_v19 = vsub.f32 %v2274_v62, %v941_v54 }
  0x9d   :  { %840 = vmatpush.msra.mxu3 %v2077_v11  ;;  %920 = vmatpush.msra.mxu1 %v919_v37  ;;  %v925_v11 = vand.u32 4294901760, %v924_v1  ;;  %v966_v40 = vsub.f32 %v2317_v28, %v2466_v14 }
  0x9e   :  { %v943_v38 = vand.u32 4294901760, %v942_v19 }
  0x9f   :  { %842 = vmatpush.msra.mxu3 %v2119_v30  ;;  %926 = vmatpush.msra.mxu1 %v925_v11  ;;  %v494_v30 = vld [vmem:[#allocation5 + $0xa8] sm:$0xff]  ;;  %v2324_v11 = vand.u32 4294901760, %v490_v10  ;;  %v967_v4 = vand.u32 4294901760, %v966_v40 }
  0xa0   :  { %v2280_v45 = vand.u32 4294901760, %v494_v30 }
  0xa1   :  { %844 = vmatpush.msra.mxu3 %v2124_v35  ;;  %v493_v35 = vld [vmem:[#allocation5 + $0xa0] sm:$0xff]  ;;  %932 = vmatpush.msra.mxu1 %v931_v0 }
  0xa2   :  { %871 = vmatpush.msra.mxu0 %v2280_v45  ;;  %v2287_v3 = vand.u32 4294901760, %v493_v35  ;;  %v2290_v12 = vsub.f32 %v494_v30, %v2280_v45  ;;  %v489_v30 = vld [vmem:[#allocation5 + $0x80] sm:$0xff] }
  0xa3   :  { %938 = vmatpush.msra.mxu1 %v937_v42  ;;  %v2336_v42 = vsub.f32 %v490_v10, %v2324_v11 }
  0xa4   :  { %873 = vmatpush.msra.mxu0 %v2287_v3  ;;  %v953_v27 = vand.u32 4294901760, %v2290_v12  ;;  %v2301_v32 = vsub.f32 %v493_v35, %v2287_v3  ;;  %v2333_v35 = vand.u32 4294901760, %v489_v30 }
  0xa5   :  { %944 = vmatpush.msra.mxu1 %v943_v38 }
  0xa6   :  { %v954_v23 = vsub.f32 %v2290_v12, %v953_v27  ;;  %875 = vmatpush.msra.mxu0 %v2298_v5  ;;  %v2469_v48 = vand.u32 4294901760, %v2301_v32  ;;  %v2342_v38 = vsub.f32 %v489_v30, %v2333_v35 }
  0xa7   :  { %950 = vmatpush.msra.mxu1 %v949_v63 }
  0xa8   :  { %v955_v37 = vand.u32 4294901760, %v954_v23  ;;  %v960_v1 = vsub.f32 %v2301_v32, %v2469_v48  ;;  %877 = vmatpush.msra.mxu0 %v2314_v56  ;;  %v983_v63 = vand.u32 4294901760, %v2342_v38 }
  0xaa   :  { %v961_v0 = vand.u32 4294901760, %v960_v1  ;;  %879 = vmatpush.msra.mxu0 %v2324_v11  ;;  %956 = vmatpush.msra.mxu1 %v955_v37  ;;  %v984_v30 = vsub.f32 %v2342_v38, %v983_v63 }
  0xac   :  { %881 = vmatpush.msra.mxu0 %v2333_v35  ;;  %962 = vmatpush.msra.mxu1 %v961_v0  ;;  %v985_v40 = vand.u32 4294901760, %v984_v30 }
  0xad   :  { %v167_v49 = vpop.f32.mrf.mxu1 }
  0xae   :  { %v168_v22 = vadd.f32 %v1589_v8, %v167_v49  ;;  %v2467_v49 = vand.u32 4294901760, %v2327_v53  ;;  %v2468_v8 = vand.u32 4294901760, %v2336_v42  ;;  %968 = vmatpush.msra.mxu1 %v967_v4 }
  0xb0   :  { %v972_v39 = vsub.f32 %v2327_v53, %v2467_v49  ;;  %v978_v23 = vsub.f32 %v2336_v42, %v2468_v8 }
  0xb2   :  { %v973_v37 = vand.u32 4294901760, %v972_v39  ;;  %v979_v1 = vand.u32 4294901760, %v978_v23 }
  0xb4   :  { %974 = vmatpush.msra.mxu1 %v973_v37 }
  0xb5   :  { %v322_v10 = vpop.f32.mrf.mxu2  ;;  %v361_v14 = vpop.f32.mrf.mxu3 }
  0xb6   :  { %980 = vmatpush.msra.mxu1 %v979_v1 }
  0xb8   :  { %986 = vmatpush.msra.mxu1 %v985_v40 }
  0xcd   :  { %v268_v19 = vpop.f32.mrf.mxu1 }
  0xce   :  { %v269_v44 = vadd.f32 %v268_v19, %v168_v22  ;;  %v430_v19 = vpop.f32.mrf.mxu0 }
  0xd0   :  { %v323_v0 = vadd.f32 %v322_v10, %v269_v44 }
  0xd2   :  { %v362_v22 = vadd.f32 %v361_v14, %v323_v0 }
  0xd4   :  { %v431_v49 = vadd.f32 %v430_v19, %v362_v22 }
  0xed   :  { %v467_v8 = vpop.f32.mrf.mxu1 }
  0xee   :  { %v2354_v48 = vadd.f32 %v467_v8, %v431_v49 }
  0xf0   :  { %v541_v4 = vand.u32 4294901760, %v2354_v48 }
  0xf2   :  { %647 = vmatmul.f32.vlgmr.msrb.gmra.mxu3 %v541_v4  ;;  %v542_v39 = vsub.f32 %v2354_v48, %v541_v4 }
  0xf3   :  { %1047 = vmatpush.msrb.mxu3 %v2158_v20 }
  0xf4   :  { %701 = vmatmul.f32.vlgmr.msrb.gmra.mxu0 %v542_v39  ;;  %v543_v23 = vand.u32 4294901760, %v542_v39 }
  0xf5   :  { %1049 = vmatpush.msrb.mxu3 %v2162_v16  ;;  %1088 = vmatpush.msrb.mxu0 %v893_v2  ;;  %v1569_v2 = vld [vmem:[#allocation7 + $0x58] sm:$0xff] }
  0xf6   :  { %740 = vmatmul.f32.vlgmr.msrb.gmra.mxu1 %v543_v23  ;;  %v544_v14 = vsub.f32 %v542_v39, %v543_v23  ;;  %v1591_v23 = vld [vmem:[%s2464_s6] ss:$0 sm:$0xff] }
  0xf7   :  { %1051 = vmatpush.msrb.mxu3 %v2164_v58  ;;  %1092 = vmatpush.msrb.mxu0 %v899_v21  ;;  %v1568_v21 = vld [vmem:[#allocation7 + $0x50] sm:$0xff] }
  0xf8   :  { %v545_v49 = vand.u32 4294901760, %v544_v14  ;;  %1155 = vmatpush.msrb.mxu1 %v2158_v20  ;;  %v2470_v20 = vand.u32 4294901760, %v2301_v32 }
  0xf9   :  { %1053 = vmatpush.msrb.mxu3 %v2194_v31  ;;  %1096 = vmatpush.msrb.mxu0 %v905_v24  ;;  %v1567_v24 = vld [vmem:[#allocation7 + $0x48] sm:$0xff] }
  0xfa   :  { %546 = vmatmul.f32.vlgmr.msrb.gmra.mxu2 %v545_v49  ;;  %846 = vmatmul.f32.vlgmr.msra.gmra.mxu3 %v541_v4 }
  0xfb   :  { %994 = vmatpush.msrb.mxu2 %v2169_v60  ;;  %1055 = vmatpush.msrb.mxu3 %v2212_v15  ;;  %v2472_v60 = vand.u32 4294901760, %v2327_v53 }
  0xfc   :  { %1157 = vmatpush.msrb.mxu1 %v2162_v16  ;;  %1100 = vmatpush.msrb.mxu0 %v911_v43  ;;  %v1572_v16 = vld [vmem:[#allocation7 + $0x70] sm:$0xff] }
  0xfd   :  { %997 = vmatpush.msrb.mxu2 %v2172_v17  ;;  %1057 = vmatpush.msrb.mxu3 %v2222_v52  ;;  %v1571_v17 = vld [vmem:[#allocation7 + $0x68] sm:$0xff]  ;;  %v1580_v43 = vld [vmem:[#allocation7 + $0xb0] sm:$0xff] }
  0xfe   :  { %1159 = vmatpush.msrb.mxu1 %v2164_v58  ;;  %887 = vmatmul.f32.vlgmr.msra.gmra.mxu0 %v1896_v7  ;;  %v1573_v7 = vld [vmem:[#allocation7 + $0x78] sm:$0xff]  ;;  %v2471_v58 = vand.u32 4294901760, %v2317_v28 }
  0xff   :  { %1000 = vmatpush.msrb.mxu2 %v2175_v61  ;;  %1059 = vmatpush.msrb.mxu3 %v2235_v6  ;;  %v2473_v61 = vand.u32 4294901760, %v2336_v42 }
 0x100   :  { %1104 = vmatpush.msrb.mxu0 %v917_v59  ;;  %1161 = vmatpush.msrb.mxu1 %v2194_v31  ;;  %v1566_v31 = vld [vmem:[#allocation7 + $0x40] sm:$0xff] }
 0x101   :  { %1003 = vmatpush.msrb.mxu2 %v2215_v51  ;;  %1061 = vmatpush.msrb.mxu3 %v2248_v34  ;;  %v1565_v51 = vld [vmem:[#allocation7 + $0x38] sm:$0xff]  ;;  %v1578_v59 = vld [vmem:[#allocation7 + $0xa0] sm:$0xff] }
 0x102   :  { %809 = vmatmul.f32.vlgmr.msra.gmra.mxu2 %v541_v4  ;;  %988 = vmatmul.f32.vlgmr.msra.gmra.mxu1 %v1810_v36 }
 0x103   :  { %1006 = vmatpush.msrb.mxu2 %v2225_v46  ;;  %1063 = vmatpush.msrb.mxu3 %v2259_v18  ;;  %v1579_v46 = vld [vmem:[#allocation7 + $0xa8] sm:$0xff] }
 0x104   :  { %1108 = vmatpush.msrb.mxu0 %v923_v29  ;;  %1163 = vmatpush.msrb.mxu1 %v2212_v15  ;;  %v1581_v15 = vld [vmem:[#allocation7 + $0xb8] sm:$0xff] }
 0x105   :  { %1009 = vmatpush.msrb.mxu2 %v2238_v25  ;;  %1065 = vmatpush.msrb.mxu3 %v2270_v57  ;;  %v1577_v25 = vld [vmem:[#allocation7 + $0x98] sm:$0xff] }
 0x106   :  { %1112 = vmatpush.msrb.mxu0 %v929_v47  ;;  %1165 = vmatpush.msrb.mxu1 %v2222_v52  ;;  %v1564_v52 = vld [vmem:[#allocation7 + $0x30] sm:$0xff]  ;;  %v1561_v29 = vld [vmem:[#allocation7 + $0x18] sm:$0xff]  ;;  %v1590_v47 = vld [vmem:[%s2462_s4] ss:$0 sm:$0xff] }
 0x107   :  { %1012 = vmatpush.msrb.mxu2 %v2251_v33  ;;  %1067 = vmatpush.msrb.mxu3 %v2280_v45  ;;  %v1560_v33 = vld [vmem:[#allocation7 + $0x10] sm:$0xff] }
 0x108   :  { %1116 = vmatpush.msrb.mxu0 %v935_v26  ;;  %1167 = vmatpush.msrb.mxu1 %v2235_v6  ;;  %v1562_v6 = vld [vmem:[#allocation7 + $0x20] sm:$0xff]  ;;  %v1559_v26 = vld [vmem:[#allocation7 + $0x8] sm:$0xff] }
 0x109   :  { %1015 = vmatpush.msrb.mxu2 %v2262_v55  ;;  %1069 = vmatpush.msrb.mxu3 %v2287_v3  ;;  %v1575_v55 = vld [vmem:[#allocation7 + $0x88] sm:$0xff] }
 0x10a   :  { %1120 = vmatpush.msrb.mxu0 %v941_v54  ;;  %1169 = vmatpush.msrb.mxu1 %v2248_v34  ;;  %v1576_v34 = vld [vmem:[#allocation7 + $0x90] sm:$0xff]  ;;  %v1558_v54 = vld [vmem:[#allocation7] sm:$0xff] }
 0x10b   :  { %1018 = vmatpush.msrb.mxu2 %v2274_v62  ;;  %1071 = vmatpush.msrb.mxu3 %v2298_v5  ;;  %v1574_v62 = vld [vmem:[#allocation7 + $0x80] sm:$0xff] }
 0x10c   :  { %1124 = vmatpush.msrb.mxu0 %v947_v13  ;;  %1171 = vmatpush.msrb.mxu1 %v2259_v18 }
 0x10d   :  { %1021 = vmatpush.msrb.mxu2 %v2284_v9  ;;  %1073 = vmatpush.msrb.mxu3 %v2314_v56 }
 0x10e   :  { %1128 = vmatpush.msrb.mxu0 %v953_v27  ;;  %1173 = vmatpush.msrb.mxu1 %v2270_v57 }
 0x10f   :  { %1024 = vmatpush.msrb.mxu2 %v2290_v12  ;;  %1075 = vmatpush.msrb.mxu3 %v2324_v11 }
 0x110   :  { %1132 = vmatpush.msrb.mxu0 %v2470_v20  ;;  %1175 = vmatpush.msrb.mxu1 %v2280_v45 }
 0x111   :  { %1027 = vmatpush.msrb.mxu2 %v2301_v32  ;;  %1077 = vmatpush.msrb.mxu3 %v2333_v35 }
 0x112   :  { %1136 = vmatpush.msrb.mxu0 %v2471_v58  ;;  %1081 = vmatmul.f32.vlgmr.msrb.gmra.mxu3 %v1849_v50  ;;  %v1570_v50 = vld [vmem:[#allocation7 + $0x60] sm:$0xff] }
 0x113   :  { %1407 = vmatpush.bf16.msra.mxu3 %v1573_v7  ;;  %1030 = vmatpush.msrb.mxu2 %v2317_v28 }
 0x114   :  { %1177 = vmatpush.msrb.mxu1 %v2287_v3  ;;  %1140 = vmatpush.msrb.mxu0 %v2472_v60  ;;  %v1592_v3 = vld [vmem:[%s2458_s0] sm:$0xff] }
 0x115   :  { %1033 = vmatpush.msrb.mxu2 %v2327_v53  ;;  %v1197_v12 = vpack.c.bf16 %v1592_v3, %v1592_v3 }
 0x116   :  { %1179 = vmatpush.msrb.mxu1 %v2298_v5  ;;  %1144 = vmatpush.msrb.mxu0 %v2473_v61 }
 0x117   :  { %1408 = vmatpush.bf16.msra.mxu3 %v1572_v16  ;;  %1036 = vmatpush.msrb.mxu2 %v2336_v42 }
 0x118   :  { %1181 = vmatpush.msrb.mxu1 %v2314_v56  ;;  %1148 = vmatpush.msrb.mxu0 %v983_v63 }
 0x119   :  { %1039 = vmatpush.msrb.mxu2 %v2342_v38  ;;  %1150 = vmatmul.f32.vlgmr.msrb.gmra.mxu0 %v1810_v36 }
 0x11a   :  { %1042 = vmatmul.f32.vlgmr.msrb.gmra.mxu2 %v1824_v41  ;;  %1183 = vmatpush.msrb.mxu1 %v2324_v11  ;;  %v1196_v41 = vpack.c.bf16 %v2354_v48, %v2354_v48 }
 0x11b   :  { %1409 = vmatpush.bf16.msra.mxu3 %v1571_v17  ;;  %1420 = vmatpush.bf16.msra.mxu0 %v1581_v15 }
 0x11c   :  { %1185 = vmatpush.msrb.mxu1 %v2333_v35  ;;  %1394 = vmatpush.bf16.msra.mxu2 %v1565_v51 }
 0x11d   :  { %1187 = vmatmul.f32.vlgmr.msrb.gmra.mxu1 %v1810_v36  ;;  %v1563_v36 = vld [vmem:[#allocation7 + $0x28] sm:$0xff] }
 0x11f   :  { %1410 = vmatpush.bf16.msra.mxu3 %v1570_v50  ;;  %1421 = vmatpush.bf16.msra.mxu0 %v1580_v43 }
 0x120   :  { %1395 = vmatpush.bf16.msra.mxu2 %v1564_v52 }
 0x123   :  { %1411 = vmatpush.bf16.msra.mxu3 %v1569_v2  ;;  %1422 = vmatpush.bf16.msra.mxu0 %v1579_v46 }
 0x124   :  { %1396 = vmatpush.bf16.msra.mxu2 %v1563_v36 }
 0x127   :  { %1412 = vmatpush.bf16.msra.mxu3 %v1568_v21  ;;  %1423 = vmatpush.bf16.msra.mxu0 %v1578_v59 }
 0x128   :  { %1397 = vmatpush.bf16.msra.mxu2 %v1562_v6 }
 0x12b   :  { %1413 = vmatpush.bf16.msra.mxu3 %v1567_v24  ;;  %1424 = vmatpush.bf16.msra.mxu0 %v1577_v25 }
 0x12c   :  { %1398 = vmatpush.bf16.msra.mxu2 %v1561_v29 }
 0x12f   :  { %1414 = vmatpush.bf16.msra.mxu3 %v1566_v31  ;;  %1425 = vmatpush.bf16.msra.mxu0 %v1576_v34 }
 0x130   :  { %1399 = vmatpush.bf16.msra.mxu2 %v1560_v33 }
 0x132   :  { %1415 = vmatmul.bf16.vlgmr.msra.gmra.mxu3 %v1196_v41 }
 0x133   :  { %1426 = vmatpush.bf16.msra.mxu0 %v1575_v55 }
 0x134   :  { %1400 = vmatpush.bf16.msra.mxu2 %v1559_v26 }
 0x137   :  { %1427 = vmatpush.bf16.msra.mxu0 %v1574_v62 }
 0x138   :  { %1401 = vmatpush.bf16.msra.mxu2 %v1558_v54 }
 0x13a   :  { %1428 = vmatmul.bf16.vlgmr.msra.gmra.mxu0 %v1197_v12 }
 0x171   :  { %v702_v13 = vpop.f32.mrf.mxu0 }
 0x173   :  { %v741_v5 = vpop.f32.mrf.mxu1 }
 0x175   :  { %v648_v45 = vpop.f32.mrf.mxu3 }
 0x17b   :  { %v888_v53 = vpop.f32.mrf.mxu0 }
 0x17d   :  { %v547_v18 = vpop.f32.mrf.mxu2  ;;  %v847_v28 = vpop.f32.mrf.mxu3 }
 0x17e   :  { %v548_v57 = vadd.f32 %v1590_v47, %v547_v18 }
 0x17f   :  { %v989_v42 = vpop.f32.mrf.mxu1 }
 0x180   :  { %v649_v9 = vadd.f32 %v648_v45, %v548_v57 }
 0x182   :  { %v703_v27 = vadd.f32 %v702_v13, %v649_v9 }
 0x184   :  { %v742_v32 = vadd.f32 %v741_v5, %v703_v27 }
 0x185   :  { %v810_v48 = vpop.f32.mrf.mxu2 }
 0x186   :  { %v811_v56 = vadd.f32 %v810_v48, %v742_v32 }
 0x188   :  { %v848_v11 = vadd.f32 %v847_v28, %v811_v56 }
 0x18a   :  { %v889_v35 = vadd.f32 %v888_v53, %v848_v11 }
 0x18c   :  { %v990_v8 = vadd.f32 %v989_v42, %v889_v35 }
 0x195   :  { %v1082_v44 = vpop.f32.mrf.mxu3 }
 0x196   :  { %v1151_v10 = vpop.f32.mrf.mxu0 }
 0x19a   :  { %v1188_v1 = vpop.f32.mrf.mxu1 }
 0x19d   :  { %v1043_v38 = vpop.f32.mrf.mxu2 }
 0x19e   :  { %v1044_v63 = vadd.f32 %v1043_v38, %v990_v8 }
 0x1a0   :  { %v1083_v37 = vadd.f32 %v1082_v44, %v1044_v63 }
 0x1a2   :  { %v1152_v30 = vadd.f32 %v1151_v10, %v1083_v37 }
 0x1a4   :  { %v1189_v0 = vadd.f32 %v1188_v1, %v1152_v30 }
 0x1a6   :  { %v1195_v40 = vpack.c.bf16 %v1189_v0, %v1189_v0 }
 0x1a8   :  { %1402 = vmatmul.bf16.vlgmr.msra.gmra.mxu2 %v1195_v40 }
 0x1b5   :  { %v1416_v22 = vpop.f32.mrf.mxu3 }
 0x1b7   :  { %v1429_v4 = vpop.f32.mrf.mxu0 }
 0x1bd   :  { %v1418_v19 = vpop.f32.mrf.mxu3 }
 0x1bf   :  { %v1431_v39 = vpop.f32.mrf.mxu0 }
 0x22b   :  { %v1403_v14 = vpop.f32.mrf.mxu2 }
 0x22c   :  { %v1404_v49 = vadd.f32 %v1591_v23, %v1403_v14 }
 0x22e   :  { %v1417_v7 = vadd.f32 %v1416_v22, %v1404_v49 }
 0x230   :  { %v1430_v20 = vadd.f32 %v1429_v4, %v1417_v7 }
 0x232   :  { %1433 = vst [vmem:[%s2465_s7] sm:$0xff] %v1430_v20 }
 0x233   :  { %v1405_v16 = vpop.f32.mrf.mxu2 }
 0x234   :  { %1449 = vsyncpa [#allocation4], 1 }
 0x235   :  { %1450 = vsyncpa [#allocation6], 1 }

</bundles_post_ra>
